<compile_context>
chip_gen: v7x
topology: tpu7x:2x2x1
jax: 0.10.0
libtpu: 0.0.40
codegen_flags: <defaults>
</compile_context>

<pallas_src>
import functools

import jax
import jax.numpy as jnp
from jax import lax
from jax.experimental import pallas as pl
from jax.experimental.pallas import tpu as pltpu

EPS = 1e-5


def _round_up(x, m):
    return ((x + m - 1) // m) * m


# ---------------------------------------------------------------------------
# Fused kernel: Conv3d -> BN -> ReLU -> Conv2d -> BN -> ReLU, all in VMEM.
# ---------------------------------------------------------------------------
def _fused_kernel(x_ref, w1_ref, b1_ref, g1_ref, be1_ref, dcol1_ref, vcol1_ref,
                  w2_ref, b2_ref, g2_ref, be2_ref, blk2_ref, inn2_ref, vm2_ref,
                  o_ref, wide_ref, im1_ref, im2_ref, *,
                  c_in, c_out, d_ch, wp, hpwp, qv1, qv2, l2p, kp1, kp2,
                  base_off, wide_w, count, eps):
    cp = o_ref.shape[0]                       # sublane-padded channel count

    # ----- stage 1: Conv3d as ONE K-packed MXU matmul -----------------------
    # x_ref is the zero-padded input flattened over (d, h, w) with radix
    # (Hp*Wp, Wp, 1).  Tap (kd,kh,kw) is the static lane window at offset
    # kd*Hp*Wp + kh*Wp + kw; the 27 windows are stacked along the contraction
    # axis of a VMEM im2col slab so the MXU sees K = 27*C_in instead of C_in.
    t = 0
    for kd in range(3):
        for kh in range(3):
            for kw in range(3):
                off = kd * hpwp + kh * wp + kw
                im1_ref[t * c_in:(t + 1) * c_in, :] = x_ref[:, off:off + qv1]
                t += 1
    if kp1 > 27 * c_in:                       # zero the K-padding rows
        im1_ref[27 * c_in:kp1, :] = jnp.zeros((kp1 - 27 * c_in, qv1),
                                              jnp.float32)
    y1 = jnp.dot(w1_ref[...], im1_ref[...],
                 preferred_element_type=jnp.float32) + b1_ref[...]   # (CP,QV1)

    # ----- BatchNorm #1 (train-mode stats over (n,h,w) per d) + ReLU --------
    # Group/valid mask gm is built IN-KERNEL from a 1-row d-coordinate vector
    # and a sublane iota (no dense mask DMA).  Two-pass (y-mean)^2 variance,
    # biased, eps=1e-5, all f32.
    rowd = lax.broadcasted_iota(jnp.int32, (d_ch, qv1), 0)
    gm = (dcol1_ref[...] == rowd).astype(jnp.float32) * vcol1_ref[...]  # (D,QV1)
    y1r = y1[:c_out, :]
    col_sum = jnp.sum(y1r, axis=0, keepdims=True)                 # (1, QV1)
    mean = jnp.sum(gm * col_sum, axis=1, keepdims=True) / count   # (D, 1)
    mean_col = jnp.sum(mean * gm, axis=0, keepdims=True)          # (1, QV1)
    diff = y1r - mean_col
    dsq = jnp.sum(diff * diff, axis=0, keepdims=True)             # (1, QV1)
    var = jnp.sum(gm * dsq, axis=1, keepdims=True) / count        # (D, 1)
    inv = lax.rsqrt(var + eps)
    scale = g1_ref[...] * inv                                     # (D, 1)
    shift = be1_ref[...] - mean * scale                           # (D, 1)
    scale_col = jnp.sum(scale * gm, axis=0, keepdims=True)        # (1, QV1)
    shift_col = jnp.sum(shift * gm, axis=0, keepdims=True)        # (1, QV1)
    y1n = jnp.maximum(y1 * scale_col + shift_col, 0.0)            # (CP, QV1)

    # ----- in-VMEM relayout, per diagonal ------------------------------------
    # y1n rows = n (= co of conv3d), lanes = padded-flat (d,h,w).  Stage 2
    # needs rows = d, lanes = padded-flat (n,h,w) with a zero border.  The
    # window offset depends only on s = d - n, so we take D+C_out-1 full-slab
    # lane windows of a zero-margined wide buffer, mask each with ONE shared
    # block/interior mask bm (source row n only contributes to block-n
    # interior lanes), and route rows n -> d = n + s with a tiny one-hot
    # matmul on the otherwise-idle MXU.  Non-interior lanes get exactly 0 (the
    # conv2d zero padding); only valid y1n columns and rows n < c_out are ever
    # read, so no reliance on padded rows / invalid columns being zero.
    wide_ref[:, 0:base_off] = jnp.zeros((cp, base_off), jnp.float32)
    wide_ref[:, base_off:base_off + qv1] = y1n
    if wide_w > base_off + qv1:               # zero only the margins
        wide_ref[:, base_off + qv1:wide_w] = jnp.zeros(
            (cp, wide_w - base_off - qv1), jnp.float32)

    rown = lax.broadcasted_iota(jnp.int32, (cp, l2p), 0)
    bm = (blk2_ref[...] == rown).astype(jnp.float32) * inn2_ref[...]   # (CP,L2P)

    rc = lax.broadcasted_iota(jnp.int32, (d_ch, cp), 0)   # target row d
    cc = lax.broadcasted_iota(jnp.int32, (d_ch, cp), 1)   # source row n
    x2 = jnp.zeros((d_ch, l2p), jnp.float32)
    for s in range(-(c_out - 1), d_ch):                   # D + C_out - 1 diags
        start = base_off + s * hpwp - (wp + 1)
        window = wide_ref[:, start:start + l2p]           # (CP, L2P) full slab
        sel = jnp.logical_and(cc == rc - s, cc < c_out).astype(jnp.float32)
        x2 = x2 + jnp.dot(sel, window * bm,
                          preferred_element_type=jnp.float32)

    # ----- stage 2: Conv2d as ONE K-packed MXU matmul ------------------------
    t = 0
    for kh in range(3):
        for kw in range(3):
            off = kh * wp + kw
            im2_ref[t * d_ch:(t + 1) * d_ch, :] = x2[:, off:off + qv2]
            t += 1
    if kp2 > 9 * d_ch:
        im2_ref[9 * d_ch:kp2, :] = jnp.zeros((kp2 - 9 * d_ch, qv2),
                                             jnp.float32)
    y2 = jnp.dot(w2_ref[...], im2_ref[...],
                 preferred_element_type=jnp.float32) + b2_ref[...]   # (CP,QV2)

    # ----- BatchNorm #2 (per output-channel row over valid columns) + ReLU --
    # Padded rows co >= c_out have exactly-zero conv output (zero weights and
    # bias), so (y2-mean2)=0 kills the rsqrt(eps) factor; those rows are
    # dropped in the wrapper anyway.
    vm2 = vm2_ref[...]                                            # (1, QV2)
    mean2 = jnp.sum(y2 * vm2, axis=1, keepdims=True) / count      # (CP, 1)
    d2 = y2 - mean2
    var2 = jnp.sum(d2 * d2 * vm2, axis=1, keepdims=True) / count
    inv2 = lax.rsqrt(var2 + eps)
    o_ref[...] = jnp.maximum(d2 * inv2 * g2_ref[...] + be2_ref[...], 0.0)


# ---------------------------------------------------------------------------
# Wrapper: cheap 1x glue (pad/flatten/coords) + one fused pallas_call.
# ---------------------------------------------------------------------------
def conv3d_block_forward(x, p):
    """x: (ch_in, D, H, W) with D == ch_out. Returns (ch_out, ch_out, H, W)."""
    C_in, D, H, W = x.shape
    C_out = p["W1"].shape[0]
    assert D == C_out, "PyTorch module requires depth D == ch_out"

    Dp, Hp, Wp = D + 2, H + 2, W + 2
    HpWp = Hp * Wp
    CP = max(_round_up(C_out, 8), 8)          # sublane-padded channel count

    # Lane-space geometry (all lane widths are multiples of 128).
    max_base1 = (D - 1) * HpWp + (H - 1) * Wp + (W - 1)
    QV1 = _round_up(max_base1 + 1, 128)
    LP1 = _round_up(max(Dp * HpWp, QV1 + 2 * HpWp + 2 * Wp + 2), 128)

    max_base2 = (C_out - 1) * HpWp + (H - 1) * Wp + (W - 1)
    QV2 = _round_up(max_base2 + 1, 128)
    L2P = _round_up(max(C_out * HpWp, QV2 + 2 * Wp + 2), 128)

    B = _round_up((C_out - 1) * HpWp + Wp + 1, 128)         # wide-buffer margin
    WIDE_W = _round_up(max(B + (D - 1) * HpWp - (Wp + 1) + L2P, B + QV1), 128)

    KP1 = _round_up(27 * C_in, 8)             # K-packed contraction sizes
    KP2 = _round_up(9 * D, 8)

    # --- glue: pad + flatten the input once (f32, no im2col in HBM) ---------
    xp = jnp.pad(x, ((0, 0), (1, 1), (1, 1), (1, 1)))
    xpf = jnp.pad(xp.reshape(C_in, Dp * HpWp),
                  ((0, 0), (0, LP1 - Dp * HpWp))).astype(jnp.float32)

    # --- weights: taps packed along the contraction axis, rows padded -------
    w1t = jnp.transpose(p["W1"], (0, 2, 3, 4, 1)).reshape(C_out, 27 * C_in)
    w1p = jnp.pad(w1t, ((0, CP - C_out), (0, KP1 - 27 * C_in))).astype(jnp.float32)
    w2t = jnp.transpose(p["W2"], (0, 2, 3, 1)).reshape(C_out, 9 * D)
    w2p = jnp.pad(w2t, ((0, CP - C_out), (0, KP2 - 9 * D))).astype(jnp.float32)

    b1 = jnp.pad(p["b1"], (0, CP - C_out)).reshape(CP, 1)
    b2 = jnp.pad(p["b2"], (0, CP - C_out)).reshape(CP, 1)
    g1 = p["g1"].reshape(D, 1)
    be1 = p["be1"].reshape(D, 1)
    g2 = jnp.pad(p["g2"], (0, CP - C_out), constant_values=1.0).reshape(CP, 1)
    be2 = jnp.pad(p["be2"], (0, CP - C_out)).reshape(CP, 1)

    # --- tiny 1-row coordinate/flag vectors (2-D masks are built in-kernel) -
    q1 = jnp.arange(QV1)
    dcol1 = (q1 // HpWp).astype(jnp.int32).reshape(1, QV1)
    vcol1 = (((q1 // HpWp) < D) & (((q1 // Wp) % Hp) < H) & ((q1 % Wp) < W)
             ).astype(jnp.float32).reshape(1, QV1)

    q2 = jnp.arange(L2P)
    blk2 = (q2 // HpWp).astype(jnp.int32).reshape(1, L2P)
    hh2, ww2 = (q2 // Wp) % Hp, q2 % Wp
    inn2 = ((hh2 >= 1) & (hh2 <= H) & (ww2 >= 1) & (ww2 <= W)
            ).astype(jnp.float32).reshape(1, L2P)

    q3 = jnp.arange(QV2)
    vm2 = (((q3 // HpWp) < C_out) & (((q3 // Wp) % Hp) < H) & ((q3 % Wp) < W)
           ).astype(jnp.float32).reshape(1, QV2)

    count = float(C_out * H * W)              # BN batch size (both BNs)

    kernel = functools.partial(
        _fused_kernel, c_in=C_in, c_out=C_out, d_ch=D, wp=Wp, hpwp=HpWp,
        qv1=QV1, qv2=QV2, l2p=L2P, kp1=KP1, kp2=KP2,
        base_off=B, wide_w=WIDE_W, count=count, eps=EPS)

    vmem = pl.BlockSpec(memory_space=pltpu.MemorySpace.VMEM)
    out_flat = pl.pallas_call(
        kernel,
        out_shape=jax.ShapeDtypeStruct((CP, QV2), jnp.float32),
        in_specs=[vmem] * 14,
        out_specs=vmem,
        scratch_shapes=[pltpu.VMEM((CP, WIDE_W), jnp.float32),
                        pltpu.VMEM((KP1, QV1), jnp.float32),
                        pltpu.VMEM((KP2, QV2), jnp.float32)],
    )(xpf, w1p, b1, g1, be1, dcol1, vcol1, w2p, b2, g2, be2, blk2, inn2, vm2)

    # --- glue: scatter valid columns back to (n, co, h, w) ------------------
    y2 = out_flat[:C_out, :]
    need = C_out * HpWp
    if QV2 < need:
        y2 = jnp.pad(y2, ((0, 0), (0, need - QV2)))
    else:
        y2 = y2[:, :need]
    y2 = y2.reshape(C_out, C_out, Hp, Wp)[:, :, :H, :W]
    return jnp.transpose(y2, (1, 0, 2, 3))


# --------------------------- pure-JAX reference ----------------------------
def reference_forward(x, p):
    hp = lax.Precision.HIGHEST
    y = lax.conv_general_dilated(
        x[None], p["W1"], (1, 1, 1), [(1, 1)] * 3,
        dimension_numbers=("NCDHW", "OIDHW", "NCDHW"), precision=hp,
    )[0] + p["b1"][:, None, None, None]                 # (C_out, D, H, W)
    mean = y.mean(axis=(0, 2, 3), keepdims=True)
    var = y.var(axis=(0, 2, 3), keepdims=True)
    y = ((y - mean) / jnp.sqrt(var + EPS)
         * p["g1"][None, :, None, None] + p["be1"][None, :, None, None])
    y = jnp.maximum(y, 0.0)
    z = lax.conv_general_dilated(
        y, p["W2"], (1, 1), [(1, 1)] * 2,
        dimension_numbers=("NCHW", "OIHW", "NCHW"), precision=hp,
    ) + p["b2"][None, :, None, None]
    mean = z.mean(axis=(0, 2, 3), keepdims=True)
    var = z.var(axis=(0, 2, 3), keepdims=True)
    z = ((z - mean) / jnp.sqrt(var + EPS)
         * p["g2"][None, :, None, None] + p["be2"][None, :, None, None])
    return jnp.maximum(z, 0.0)


def init_params(key, ch_in, ch_out):
    ks = jax.random.split(key, 8)
    return {
        "W1": 0.1 * jax.random.normal(ks[0], (ch_out, ch_in, 3, 3, 3), jnp.float32),
        "b1": 0.1 * jax.random.normal(ks[1], (ch_out,), jnp.float32),
        "g1": 1.0 + 0.1 * jax.random.normal(ks[2], (ch_out,), jnp.float32),
        "be1": 0.1 * jax.random.normal(ks[3], (ch_out,), jnp.float32),
        "W2": 0.1 * jax.random.normal(ks[4], (ch_out, ch_out, 3, 3), jnp.float32),
        "b2": 0.1 * jax.random.normal(ks[5], (ch_out,), jnp.float32),
        "g2": 1.0 + 0.1 * jax.random.normal(ks[6], (ch_out,), jnp.float32),
        "be2": 0.1 * jax.random.normal(ks[7], (ch_out,), jnp.float32),
    }


if __name__ == "__main__":
    ch_in, ch_out = 2, 4
    D, H, W = ch_out, 8, 8          # D must equal ch_out for the module to run
    key = jax.random.PRNGKey(0)
    kx, kp = jax.random.split(key)
    x = jax.random.normal(kx, (ch_in, D, H, W), jnp.float32)
    params = init_params(kp, ch_in, ch_out)

    out = jax.jit(conv3d_block_forward)(x, params)
    out = jax.block_until_ready(out)
    assert out.shape == (ch_out, ch_out, H, W), out.shape

    ref = reference_forward(x, params)
    err = float(jnp.max(jnp.abs(out - ref)))
    # All-f32 conv operands now; expected error is ~1e-4-scale.  Keep the
    # previous (generous) gate so the check is robust across MXU f32 modes.
    if err > 5e-2:
        raise AssertionError(f"mismatch vs reference, max abs err = {err}")
    print("KERNEL_OK")
</pallas_src>

<mosaic_0001>
module attributes {stable_mosaic.version = 11 : i64} {
  func.func @_fused_kernel(%arg0: memref<2x640xf32, #tpu.memory_space<vmem>>, %arg1: memref<8x56xf32, #tpu.memory_space<vmem>>, %arg2: memref<8x1xf32, #tpu.memory_space<vmem>>, %arg3: memref<4x1xf32, #tpu.memory_space<vmem>>, %arg4: memref<4x1xf32, #tpu.memory_space<vmem>>, %arg5: memref<1x384xi32, #tpu.memory_space<vmem>>, %arg6: memref<1x384xf32, #tpu.memory_space<vmem>>, %arg7: memref<8x40xf32, #tpu.memory_space<vmem>>, %arg8: memref<8x1xf32, #tpu.memory_space<vmem>>, %arg9: memref<8x1xf32, #tpu.memory_space<vmem>>, %arg10: memref<8x1xf32, #tpu.memory_space<vmem>>, %arg11: memref<1x512xi32, #tpu.memory_space<vmem>>, %arg12: memref<1x512xf32, #tpu.memory_space<vmem>>, %arg13: memref<1x384xf32, #tpu.memory_space<vmem>>, %arg14: memref<8x384xf32, #tpu.memory_space<vmem>>, %arg15: memref<8x1280xf32, #tpu.memory_space<vmem>>, %arg16: memref<56x384xf32, #tpu.memory_space<vmem>>, %arg17: memref<40x384xf32, #tpu.memory_space<vmem>>) attributes {dimension_semantics = [], scalar_prefetch = 0 : i64, scratch_operands = 3 : i64, tpu.core_type = #tpu.core_type<tc>} {
    %c0 = arith.constant 0 : index
    %c0_0 = arith.constant 0 : index
    %0 = vector.load %arg0[%c0, %c0_0] : memref<2x640xf32, #tpu.memory_space<vmem>>, vector<2x384xf32>
    %c0_1 = arith.constant 0 : index
    %c0_2 = arith.constant 0 : index
    %1 = vector.load %arg16[%c0_1, %c0_2] : memref<56x384xf32, #tpu.memory_space<vmem>>, vector<2x384xf32>
    tpu.vector_store %arg16[%c0_1, %c0_2], %0 {strides = array<i32>} : memref<56x384xf32, #tpu.memory_space<vmem>>, vector<2x384xf32>,
    %c0_3 = arith.constant 0 : index
    %c1 = arith.constant 1 : index
    %2 = vector.load %arg0[%c0_3, %c1] : memref<2x640xf32, #tpu.memory_space<vmem>>, vector<2x384xf32>
    %c2 = arith.constant 2 : index
    %c0_4 = arith.constant 0 : index
    %3 = vector.load %arg16[%c2, %c0_4] : memref<56x384xf32, #tpu.memory_space<vmem>>, vector<2x384xf32>
    tpu.vector_store %arg16[%c2, %c0_4], %2 {strides = array<i32>} : memref<56x384xf32, #tpu.memory_space<vmem>>, vector<2x384xf32>,
    %c0_5 = arith.constant 0 : index
    %c2_6 = arith.constant 2 : index
    %4 = vector.load %arg0[%c0_5, %c2_6] : memref<2x640xf32, #tpu.memory_space<vmem>>, vector<2x384xf32>
    %c4 = arith.constant 4 : index
    %c0_7 = arith.constant 0 : index
    %5 = vector.load %arg16[%c4, %c0_7] : memref<56x384xf32, #tpu.memory_space<vmem>>, vector<2x384xf32>
    tpu.vector_store %arg16[%c4, %c0_7], %4 {strides = array<i32>} : memref<56x384xf32, #tpu.memory_space<vmem>>, vector<2x384xf32>,
    %c0_8 = arith.constant 0 : index
    %c10 = arith.constant 10 : index
    %6 = vector.load %arg0[%c0_8, %c10] : memref<2x640xf32, #tpu.memory_space<vmem>>, vector<2x384xf32>
    %c6 = arith.constant 6 : index
    %c0_9 = arith.constant 0 : index
    %7 = vector.load %arg16[%c6, %c0_9] : memref<56x384xf32, #tpu.memory_space<vmem>>, vector<2x384xf32>
    tpu.vector_store %arg16[%c6, %c0_9], %6 {strides = array<i32>} : memref<56x384xf32, #tpu.memory_space<vmem>>, vector<2x384xf32>,
    %c0_10 = arith.constant 0 : index
    %c11 = arith.constant 11 : index
    %8 = vector.load %arg0[%c0_10, %c11] : memref<2x640xf32, #tpu.memory_space<vmem>>, vector<2x384xf32>
    %c8 = arith.constant 8 : index
    %c0_11 = arith.constant 0 : index
    %9 = vector.load %arg16[%c8, %c0_11] : memref<56x384xf32, #tpu.memory_space<vmem>>, vector<2x384xf32>
    tpu.vector_store %arg16[%c8, %c0_11], %8 {strides = array<i32>} : memref<56x384xf32, #tpu.memory_space<vmem>>, vector<2x384xf32>,
    %c0_12 = arith.constant 0 : index
    %c12 = arith.constant 12 : index
    %10 = vector.load %arg0[%c0_12, %c12] : memref<2x640xf32, #tpu.memory_space<vmem>>, vector<2x384xf32>
    %c10_13 = arith.constant 10 : index
    %c0_14 = arith.constant 0 : index
    %11 = vector.load %arg16[%c10_13, %c0_14] : memref<56x384xf32, #tpu.memory_space<vmem>>, vector<2x384xf32>
    tpu.vector_store %arg16[%c10_13, %c0_14], %10 {strides = array<i32>} : memref<56x384xf32, #tpu.memory_space<vmem>>, vector<2x384xf32>,
    %c0_15 = arith.constant 0 : index
    %c20 = arith.constant 20 : index
    %12 = vector.load %arg0[%c0_15, %c20] : memref<2x640xf32, #tpu.memory_space<vmem>>, vector<2x384xf32>
    %c12_16 = arith.constant 12 : index
    %c0_17 = arith.constant 0 : index
    %13 = vector.load %arg16[%c12_16, %c0_17] : memref<56x384xf32, #tpu.memory_space<vmem>>, vector<2x384xf32>
    tpu.vector_store %arg16[%c12_16, %c0_17], %12 {strides = array<i32>} : memref<56x384xf32, #tpu.memory_space<vmem>>, vector<2x384xf32>,
    %c0_18 = arith.constant 0 : index
    %c21 = arith.constant 21 : index
    %14 = vector.load %arg0[%c0_18, %c21] : memref<2x640xf32, #tpu.memory_space<vmem>>, vector<2x384xf32>
    %c14 = arith.constant 14 : index
    %c0_19 = arith.constant 0 : index
    %15 = vector.load %arg16[%c14, %c0_19] : memref<56x384xf32, #tpu.memory_space<vmem>>, vector<2x384xf32>
    tpu.vector_store %arg16[%c14, %c0_19], %14 {strides = array<i32>} : memref<56x384xf32, #tpu.memory_space<vmem>>, vector<2x384xf32>,
    %c0_20 = arith.constant 0 : index
    %c22 = arith.constant 22 : index
    %16 = vector.load %arg0[%c0_20, %c22] : memref<2x640xf32, #tpu.memory_space<vmem>>, vector<2x384xf32>
    %c16 = arith.constant 16 : index
    %c0_21 = arith.constant 0 : index
    %17 = vector.load %arg16[%c16, %c0_21] : memref<56x384xf32, #tpu.memory_space<vmem>>, vector<2x384xf32>
    tpu.vector_store %arg16[%c16, %c0_21], %16 {strides = array<i32>} : memref<56x384xf32, #tpu.memory_space<vmem>>, vector<2x384xf32>,
    %c0_22 = arith.constant 0 : index
    %c100 = arith.constant 100 : index
    %18 = vector.load %arg0[%c0_22, %c100] : memref<2x640xf32, #tpu.memory_space<vmem>>, vector<2x384xf32>
    %c18 = arith.constant 18 : index
    %c0_23 = arith.constant 0 : index
    %19 = vector.load %arg16[%c18, %c0_23] : memref<56x384xf32, #tpu.memory_space<vmem>>, vector<2x384xf32>
    tpu.vector_store %arg16[%c18, %c0_23], %18 {strides = array<i32>} : memref<56x384xf32, #tpu.memory_space<vmem>>, vector<2x384xf32>,
    %c0_24 = arith.constant 0 : index
    %c101 = arith.constant 101 : index
    %20 = vector.load %arg0[%c0_24, %c101] : memref<2x640xf32, #tpu.memory_space<vmem>>, vector<2x384xf32>
    %c20_25 = arith.constant 20 : index
    %c0_26 = arith.constant 0 : index
    %21 = vector.load %arg16[%c20_25, %c0_26] : memref<56x384xf32, #tpu.memory_space<vmem>>, vector<2x384xf32>
    tpu.vector_store %arg16[%c20_25, %c0_26], %20 {strides = array<i32>} : memref<56x384xf32, #tpu.memory_space<vmem>>, vector<2x384xf32>,
    %c0_27 = arith.constant 0 : index
    %c102 = arith.constant 102 : index
    %22 = vector.load %arg0[%c0_27, %c102] : memref<2x640xf32, #tpu.memory_space<vmem>>, vector<2x384xf32>
    %c22_28 = arith.constant 22 : index
    %c0_29 = arith.constant 0 : index
    %23 = vector.load %arg16[%c22_28, %c0_29] : memref<56x384xf32, #tpu.memory_space<vmem>>, vector<2x384xf32>
    tpu.vector_store %arg16[%c22_28, %c0_29], %22 {strides = array<i32>} : memref<56x384xf32, #tpu.memory_space<vmem>>, vector<2x384xf32>,
    %c0_30 = arith.constant 0 : index
    %c110 = arith.constant 110 : index
    %24 = vector.load %arg0[%c0_30, %c110] : memref<2x640xf32, #tpu.memory_space<vmem>>, vector<2x384xf32>
    %c24 = arith.constant 24 : index
    %c0_31 = arith.constant 0 : index
    %25 = vector.load %arg16[%c24, %c0_31] : memref<56x384xf32, #tpu.memory_space<vmem>>, vector<2x384xf32>
    tpu.vector_store %arg16[%c24, %c0_31], %24 {strides = array<i32>} : memref<56x384xf32, #tpu.memory_space<vmem>>, vector<2x384xf32>,
    %c0_32 = arith.constant 0 : index
    %c111 = arith.constant 111 : index
    %26 = vector.load %arg0[%c0_32, %c111] : memref<2x640xf32, #tpu.memory_space<vmem>>, vector<2x384xf32>
    %c26 = arith.constant 26 : index
    %c0_33 = arith.constant 0 : index
    %27 = vector.load %arg16[%c26, %c0_33] : memref<56x384xf32, #tpu.memory_space<vmem>>, vector<2x384xf32>
    tpu.vector_store %arg16[%c26, %c0_33], %26 {strides = array<i32>} : memref<56x384xf32, #tpu.memory_space<vmem>>, vector<2x384xf32>,
    %c0_34 = arith.constant 0 : index
    %c112 = arith.constant 112 : index
    %28 = vector.load %arg0[%c0_34, %c112] : memref<2x640xf32, #tpu.memory_space<vmem>>, vector<2x384xf32>
    %c28 = arith.constant 28 : index
    %c0_35 = arith.constant 0 : index
    %29 = vector.load %arg16[%c28, %c0_35] : memref<56x384xf32, #tpu.memory_space<vmem>>, vector<2x384xf32>
    tpu.vector_store %arg16[%c28, %c0_35], %28 {strides = array<i32>} : memref<56x384xf32, #tpu.memory_space<vmem>>, vector<2x384xf32>,
    %c0_36 = arith.constant 0 : index
    %c120 = arith.constant 120 : index
    %30 = vector.load %arg0[%c0_36, %c120] : memref<2x640xf32, #tpu.memory_space<vmem>>, vector<2x384xf32>
    %c30 = arith.constant 30 : index
    %c0_37 = arith.constant 0 : index
    %31 = vector.load %arg16[%c30, %c0_37] : memref<56x384xf32, #tpu.memory_space<vmem>>, vector<2x384xf32>
    tpu.vector_store %arg16[%c30, %c0_37], %30 {strides = array<i32>} : memref<56x384xf32, #tpu.memory_space<vmem>>, vector<2x384xf32>,
    %c0_38 = arith.constant 0 : index
    %c121 = arith.constant 121 : index
    %32 = vector.load %arg0[%c0_38, %c121] : memref<2x640xf32, #tpu.memory_space<vmem>>, vector<2x384xf32>
    %c32 = arith.constant 32 : index
    %c0_39 = arith.constant 0 : index
    %33 = vector.load %arg16[%c32, %c0_39] : memref<56x384xf32, #tpu.memory_space<vmem>>, vector<2x384xf32>
    tpu.vector_store %arg16[%c32, %c0_39], %32 {strides = array<i32>} : memref<56x384xf32, #tpu.memory_space<vmem>>, vector<2x384xf32>,
    %c0_40 = arith.constant 0 : index
    %c122 = arith.constant 122 : index
    %34 = vector.load %arg0[%c0_40, %c122] : memref<2x640xf32, #tpu.memory_space<vmem>>, vector<2x384xf32>
    %c34 = arith.constant 34 : index
    %c0_41 = arith.constant 0 : index
    %35 = vector.load %arg16[%c34, %c0_41] : memref<56x384xf32, #tpu.memory_space<vmem>>, vector<2x384xf32>
    tpu.vector_store %arg16[%c34, %c0_41], %34 {strides = array<i32>} : memref<56x384xf32, #tpu.memory_space<vmem>>, vector<2x384xf32>,
    %c0_42 = arith.constant 0 : index
    %c200 = arith.constant 200 : index
    %36 = vector.load %arg0[%c0_42, %c200] : memref<2x640xf32, #tpu.memory_space<vmem>>, vector<2x384xf32>
    %c36 = arith.constant 36 : index
    %c0_43 = arith.constant 0 : index
    %37 = vector.load %arg16[%c36, %c0_43] : memref<56x384xf32, #tpu.memory_space<vmem>>, vector<2x384xf32>
    tpu.vector_store %arg16[%c36, %c0_43], %36 {strides = array<i32>} : memref<56x384xf32, #tpu.memory_space<vmem>>, vector<2x384xf32>,
    %c0_44 = arith.constant 0 : index
    %c201 = arith.constant 201 : index
    %38 = vector.load %arg0[%c0_44, %c201] : memref<2x640xf32, #tpu.memory_space<vmem>>, vector<2x384xf32>
    %c38 = arith.constant 38 : index
    %c0_45 = arith.constant 0 : index
    %39 = vector.load %arg16[%c38, %c0_45] : memref<56x384xf32, #tpu.memory_space<vmem>>, vector<2x384xf32>
    tpu.vector_store %arg16[%c38, %c0_45], %38 {strides = array<i32>} : memref<56x384xf32, #tpu.memory_space<vmem>>, vector<2x384xf32>,
    %c0_46 = arith.constant 0 : index
    %c202 = arith.constant 202 : index
    %40 = vector.load %arg0[%c0_46, %c202] : memref<2x640xf32, #tpu.memory_space<vmem>>, vector<2x384xf32>
    %c40 = arith.constant 40 : index
    %c0_47 = arith.constant 0 : index
    %41 = vector.load %arg16[%c40, %c0_47] : memref<56x384xf32, #tpu.memory_space<vmem>>, vector<2x384xf32>
    tpu.vector_store %arg16[%c40, %c0_47], %40 {strides = array<i32>} : memref<56x384xf32, #tpu.memory_space<vmem>>, vector<2x384xf32>,
    %c0_48 = arith.constant 0 : index
    %c210 = arith.constant 210 : index
    %42 = vector.load %arg0[%c0_48, %c210] : memref<2x640xf32, #tpu.memory_space<vmem>>, vector<2x384xf32>
    %c42 = arith.constant 42 : index
    %c0_49 = arith.constant 0 : index
    %43 = vector.load %arg16[%c42, %c0_49] : memref<56x384xf32, #tpu.memory_space<vmem>>, vector<2x384xf32>
    tpu.vector_store %arg16[%c42, %c0_49], %42 {strides = array<i32>} : memref<56x384xf32, #tpu.memory_space<vmem>>, vector<2x384xf32>,
    %c0_50 = arith.constant 0 : index
    %c211 = arith.constant 211 : index
    %44 = vector.load %arg0[%c0_50, %c211] : memref<2x640xf32, #tpu.memory_space<vmem>>, vector<2x384xf32>
    %c44 = arith.constant 44 : index
    %c0_51 = arith.constant 0 : index
    %45 = vector.load %arg16[%c44, %c0_51] : memref<56x384xf32, #tpu.memory_space<vmem>>, vector<2x384xf32>
    tpu.vector_store %arg16[%c44, %c0_51], %44 {strides = array<i32>} : memref<56x384xf32, #tpu.memory_space<vmem>>, vector<2x384xf32>,
    %c0_52 = arith.constant 0 : index
    %c212 = arith.constant 212 : index
    %46 = vector.load %arg0[%c0_52, %c212] : memref<2x640xf32, #tpu.memory_space<vmem>>, vector<2x384xf32>
    %c46 = arith.constant 46 : index
    %c0_53 = arith.constant 0 : index
    %47 = vector.load %arg16[%c46, %c0_53] : memref<56x384xf32, #tpu.memory_space<vmem>>, vector<2x384xf32>
    tpu.vector_store %arg16[%c46, %c0_53], %46 {strides = array<i32>} : memref<56x384xf32, #tpu.memory_space<vmem>>, vector<2x384xf32>,
    %c0_54 = arith.constant 0 : index
    %c220 = arith.constant 220 : index
    %48 = vector.load %arg0[%c0_54, %c220] : memref<2x640xf32, #tpu.memory_space<vmem>>, vector<2x384xf32>
    %c48 = arith.constant 48 : index
    %c0_55 = arith.constant 0 : index
    %49 = vector.load %arg16[%c48, %c0_55] : memref<56x384xf32, #tpu.memory_space<vmem>>, vector<2x384xf32>
    tpu.vector_store %arg16[%c48, %c0_55], %48 {strides = array<i32>} : memref<56x384xf32, #tpu.memory_space<vmem>>, vector<2x384xf32>,
    %c0_56 = arith.constant 0 : index
    %c221 = arith.constant 221 : index
    %50 = vector.load %arg0[%c0_56, %c221] : memref<2x640xf32, #tpu.memory_space<vmem>>, vector<2x384xf32>
    %c50 = arith.constant 50 : index
    %c0_57 = arith.constant 0 : index
    %51 = vector.load %arg16[%c50, %c0_57] : memref<56x384xf32, #tpu.memory_space<vmem>>, vector<2x384xf32>
    tpu.vector_store %arg16[%c50, %c0_57], %50 {strides = array<i32>} : memref<56x384xf32, #tpu.memory_space<vmem>>, vector<2x384xf32>,
    %c0_58 = arith.constant 0 : index
    %c222 = arith.constant 222 : index
    %52 = vector.load %arg0[%c0_58, %c222] : memref<2x640xf32, #tpu.memory_space<vmem>>, vector<2x384xf32>
    %c52 = arith.constant 52 : index
    %c0_59 = arith.constant 0 : index
    %53 = vector.load %arg16[%c52, %c0_59] : memref<56x384xf32, #tpu.memory_space<vmem>>, vector<2x384xf32>
    tpu.vector_store %arg16[%c52, %c0_59], %52 {strides = array<i32>} : memref<56x384xf32, #tpu.memory_space<vmem>>, vector<2x384xf32>,
    %cst = arith.constant 0.000000e+00 : f32
    %54 = vector.broadcast %cst : f32 to vector<2x384xf32>
    %c54 = arith.constant 54 : index
    %c0_60 = arith.constant 0 : index
    %55 = vector.load %arg16[%c54, %c0_60] : memref<56x384xf32, #tpu.memory_space<vmem>>, vector<2x384xf32>
    tpu.vector_store %arg16[%c54, %c0_60], %54 {strides = array<i32>} : memref<56x384xf32, #tpu.memory_space<vmem>>, vector<2x384xf32>,
    %c0_61 = arith.constant 0 : index
    %c0_62 = arith.constant 0 : index
    %56 = vector.load %arg1[%c0_61, %c0_62] : memref<8x56xf32, #tpu.memory_space<vmem>>, vector<8x56xf32>
    %c0_63 = arith.constant 0 : index
    %c0_64 = arith.constant 0 : index
    %57 = vector.load %arg16[%c0_63, %c0_64] : memref<56x384xf32, #tpu.memory_space<vmem>>, vector<56x384xf32>
    %cst_65 = arith.constant dense<0.000000e+00> : vector<8x384xf32>
    %58 = tpu.matmul %56, %57, %cst_65 {dimension_numbers = #tpu.dot_dimension_numbers<[1], [0], [0], [1], [0, 0, 1, 1], [], []>} : vector<8x56xf32>, vector<56x384xf32>, vector<8x384xf32> -> vector<8x384xf32>
    %c0_66 = arith.constant 0 : index
    %c0_67 = arith.constant 0 : index
    %59 = vector.load %arg2[%c0_66, %c0_67] : memref<8x1xf32, #tpu.memory_space<vmem>>, vector<8x1xf32>
    %60 = vector.broadcast %59 : vector<8x1xf32> to vector<8x384xf32>
    %61 = arith.addf %58, %60 : vector<8x384xf32>
    %62 = tpu.iota {dimensions = array<i32: 0>} : vector<4x384xi32>
    %c0_68 = arith.constant 0 : index
    %c0_69 = arith.constant 0 : index
    %63 = vector.load %arg5[%c0_68, %c0_69] : memref<1x384xi32, #tpu.memory_space<vmem>>, vector<1x384xi32>
    %64 = vector.broadcast %63 : vector<1x384xi32> to vector<4x384xi32>
    %65 = arith.cmpi eq, %64, %62 : vector<4x384xi32>
    %66 = arith.extui %65 : vector<4x384xi1> to vector<4x384xi32>
    %67 = arith.sitofp %66 : vector<4x384xi32> to vector<4x384xf32>
    %c0_70 = arith.constant 0 : index
    %c0_71 = arith.constant 0 : index
    %68 = vector.load %arg6[%c0_70, %c0_71] : memref<1x384xf32, #tpu.memory_space<vmem>>, vector<1x384xf32>
    %69 = vector.broadcast %68 : vector<1x384xf32> to vector<4x384xf32>
    %70 = arith.mulf %67, %69 : vector<4x384xf32>
    %71 = vector.extract_strided_slice %61 {offsets = [0, 0], sizes = [4, 384], strides = [1, 1]} : vector<8x384xf32> to vector<4x384xf32>
    %cst_72 = arith.constant dense<0.000000e+00> : vector<384xf32>
    %72 = vector.multi_reduction <add>, %71, %cst_72 [0] : vector<4x384xf32> to vector<384xf32>
    %73 = vector.shape_cast %72 : vector<384xf32> to vector<1x384xf32>
    %74 = vector.broadcast %73 : vector<1x384xf32> to vector<4x384xf32>
    %75 = arith.mulf %70, %74 : vector<4x384xf32>
    %cst_73 = arith.constant dense<0.000000e+00> : vector<4xf32>
    %76 = vector.multi_reduction <add>, %75, %cst_73 [1] : vector<4x384xf32> to vector<4xf32>
    %77 = vector.shape_cast %76 : vector<4xf32> to vector<4x1xf32>
    %cst_74 = arith.constant 2.560000e+02 : f32
    %78 = vector.broadcast %cst_74 : f32 to vector<4x1xf32>
    %79 = arith.divf %77, %78 : vector<4x1xf32>
    %80 = vector.broadcast %79 : vector<4x1xf32> to vector<4x384xf32>
    %81 = arith.mulf %80, %70 : vector<4x384xf32>
    %cst_75 = arith.constant dense<0.000000e+00> : vector<384xf32>
    %82 = vector.multi_reduction <add>, %81, %cst_75 [0] : vector<4x384xf32> to vector<384xf32>
    %83 = vector.shape_cast %82 : vector<384xf32> to vector<1x384xf32>
    %84 = vector.broadcast %83 : vector<1x384xf32> to vector<4x384xf32>
    %85 = arith.subf %71, %84 : vector<4x384xf32>
    %86 = arith.mulf %85, %85 : vector<4x384xf32>
    %cst_76 = arith.constant dense<0.000000e+00> : vector<384xf32>
    %87 = vector.multi_reduction <add>, %86, %cst_76 [0] : vector<4x384xf32> to vector<384xf32>
    %88 = vector.shape_cast %87 : vector<384xf32> to vector<1x384xf32>
    %89 = vector.broadcast %88 : vector<1x384xf32> to vector<4x384xf32>
    %90 = arith.mulf %70, %89 : vector<4x384xf32>
    %cst_77 = arith.constant dense<0.000000e+00> : vector<4xf32>
    %91 = vector.multi_reduction <add>, %90, %cst_77 [1] : vector<4x384xf32> to vector<4xf32>
    %92 = vector.shape_cast %91 : vector<4xf32> to vector<4x1xf32>
    %cst_78 = arith.constant 2.560000e+02 : f32
    %93 = vector.broadcast %cst_78 : f32 to vector<4x1xf32>
    %94 = arith.divf %92, %93 : vector<4x1xf32>
    %cst_79 = arith.constant 9.99999974E-6 : f32
    %95 = vector.broadcast %cst_79 : f32 to vector<4x1xf32>
    %96 = arith.addf %94, %95 : vector<4x1xf32>
    %97 = math.rsqrt %96 : vector<4x1xf32>
    %c0_80 = arith.constant 0 : index
    %c0_81 = arith.constant 0 : index
    %98 = vector.load %arg3[%c0_80, %c0_81] : memref<4x1xf32, #tpu.memory_space<vmem>>, vector<4x1xf32>
    %99 = arith.mulf %98, %97 : vector<4x1xf32>
    %c0_82 = arith.constant 0 : index
    %c0_83 = arith.constant 0 : index
    %100 = vector.load %arg4[%c0_82, %c0_83] : memref<4x1xf32, #tpu.memory_space<vmem>>, vector<4x1xf32>
    %101 = arith.mulf %79, %99 : vector<4x1xf32>
    %102 = arith.subf %100, %101 : vector<4x1xf32>
    %103 = vector.broadcast %99 : vector<4x1xf32> to vector<4x384xf32>
    %104 = arith.mulf %103, %70 : vector<4x384xf32>
    %cst_84 = arith.constant dense<0.000000e+00> : vector<384xf32>
    %105 = vector.multi_reduction <add>, %104, %cst_84 [0] : vector<4x384xf32> to vector<384xf32>
    %106 = vector.shape_cast %105 : vector<384xf32> to vector<1x384xf32>
    %107 = vector.broadcast %102 : vector<4x1xf32> to vector<4x384xf32>
    %108 = arith.mulf %107, %70 : vector<4x384xf32>
    %cst_85 = arith.constant dense<0.000000e+00> : vector<384xf32>
    %109 = vector.multi_reduction <add>, %108, %cst_85 [0] : vector<4x384xf32> to vector<384xf32>
    %110 = vector.shape_cast %109 : vector<384xf32> to vector<1x384xf32>
    %111 = vector.broadcast %106 : vector<1x384xf32> to vector<8x384xf32>
    %112 = arith.mulf %61, %111 : vector<8x384xf32>
    %113 = vector.broadcast %110 : vector<1x384xf32> to vector<8x384xf32>
    %114 = arith.addf %112, %113 : vector<8x384xf32>
    %cst_86 = arith.constant 0.000000e+00 : f32
    %115 = vector.broadcast %cst_86 : f32 to vector<8x384xf32>
    %116 = arith.maximumf %114, %115 : vector<8x384xf32>
    %cst_87 = arith.constant 0.000000e+00 : f32
    %117 = vector.broadcast %cst_87 : f32 to vector<8x384xf32>
    %c0_88 = arith.constant 0 : index
    %c0_89 = arith.constant 0 : index
    %118 = vector.load %arg15[%c0_88, %c0_89] : memref<8x1280xf32, #tpu.memory_space<vmem>>, vector<8x384xf32>
    tpu.vector_store %arg15[%c0_88, %c0_89], %117 {strides = array<i32>} : memref<8x1280xf32, #tpu.memory_space<vmem>>, vector<8x384xf32>,
    %c0_90 = arith.constant 0 : index
    %c384 = arith.constant 384 : index
    %119 = vector.load %arg15[%c0_90, %c384] : memref<8x1280xf32, #tpu.memory_space<vmem>>, vector<8x384xf32>
    tpu.vector_store %arg15[%c0_90, %c384], %116 {strides = array<i32>} : memref<8x1280xf32, #tpu.memory_space<vmem>>, vector<8x384xf32>,
    %cst_91 = arith.constant 0.000000e+00 : f32
    %120 = vector.broadcast %cst_91 : f32 to vector<8x512xf32>
    %c0_92 = arith.constant 0 : index
    %c768 = arith.constant 768 : index
    %121 = vector.load %arg15[%c0_92, %c768] : memref<8x1280xf32, #tpu.memory_space<vmem>>, vector<8x512xf32>
    tpu.vector_store %arg15[%c0_92, %c768], %120 {strides = array<i32>} : memref<8x1280xf32, #tpu.memory_space<vmem>>, vector<8x512xf32>,
    %122 = tpu.iota {dimensions = array<i32: 0>} : vector<8x512xi32>
    %c0_93 = arith.constant 0 : index
    %c0_94 = arith.constant 0 : index
    %123 = vector.load %arg11[%c0_93, %c0_94] : memref<1x512xi32, #tpu.memory_space<vmem>>, vector<1x512xi32>
    %124 = vector.broadcast %123 : vector<1x512xi32> to vector<8x512xi32>
    %125 = arith.cmpi eq, %124, %122 : vector<8x512xi32>
    %126 = arith.extui %125 : vector<8x512xi1> to vector<8x512xi32>
    %127 = arith.sitofp %126 : vector<8x512xi32> to vector<8x512xf32>
    %c0_95 = arith.constant 0 : index
    %c0_96 = arith.constant 0 : index
    %128 = vector.load %arg12[%c0_95, %c0_96] : memref<1x512xf32, #tpu.memory_space<vmem>>, vector<1x512xf32>
    %129 = vector.broadcast %128 : vector<1x512xf32> to vector<8x512xf32>
    %130 = arith.mulf %127, %129 : vector<8x512xf32>
    %131 = tpu.iota {dimensions = array<i32: 0>} : vector<4x8xi32>
    %132 = tpu.iota {dimensions = array<i32: 1>} : vector<4x8xi32>
    %cst_97 = arith.constant 0.000000e+00 : f32
    %133 = vector.broadcast %cst_97 : f32 to vector<4x512xf32>
    %c0_98 = arith.constant 0 : index
    %c73 = arith.constant 73 : index
    %134 = vector.load %arg15[%c0_98, %c73] : memref<8x1280xf32, #tpu.memory_space<vmem>>, vector<8x512xf32>
    %c-3_i32 = arith.constant -3 : i32
    %135 = vector.broadcast %c-3_i32 : i32 to vector<4x8xi32>
    %136 = arith.subi %131, %135 : vector<4x8xi32>
    %137 = arith.cmpi eq, %132, %136 : vector<4x8xi32>
    %c4_i32 = arith.constant 4 : i32
    %138 = vector.broadcast %c4_i32 : i32 to vector<4x8xi32>
    %139 = arith.cmpi slt, %132, %138 : vector<4x8xi32>
    %140 = arith.andi %137, %139 : vector<4x8xi1>
    %141 = arith.extui %140 : vector<4x8xi1> to vector<4x8xi32>
    %142 = arith.sitofp %141 : vector<4x8xi32> to vector<4x8xf32>
    %143 = arith.mulf %134, %130 : vector<8x512xf32>
    %cst_99 = arith.constant dense<0.000000e+00> : vector<4x512xf32>
    %144 = tpu.matmul %142, %143, %cst_99 {dimension_numbers = #tpu.dot_dimension_numbers<[1], [0], [0], [1], [0, 0, 1, 1], [], []>} : vector<4x8xf32>, vector<8x512xf32>, vector<4x512xf32> -> vector<4x512xf32>
    %145 = arith.addf %133, %144 : vector<4x512xf32>
    %c0_100 = arith.constant 0 : index
    %c173 = arith.constant 173 : index
    %146 = vector.load %arg15[%c0_100, %c173] : memref<8x1280xf32, #tpu.memory_space<vmem>>, vector<8x512xf32>
    %c-2_i32 = arith.constant -2 : i32
    %147 = vector.broadcast %c-2_i32 : i32 to vector<4x8xi32>
    %148 = arith.subi %131, %147 : vector<4x8xi32>
    %149 = arith.cmpi eq, %132, %148 : vector<4x8xi32>
    %c4_i32_101 = arith.constant 4 : i32
    %150 = vector.broadcast %c4_i32_101 : i32 to vector<4x8xi32>
    %151 = arith.cmpi slt, %132, %150 : vector<4x8xi32>
    %152 = arith.andi %149, %151 : vector<4x8xi1>
    %153 = arith.extui %152 : vector<4x8xi1> to vector<4x8xi32>
    %154 = arith.sitofp %153 : vector<4x8xi32> to vector<4x8xf32>
    %155 = arith.mulf %146, %130 : vector<8x512xf32>
    %cst_102 = arith.constant dense<0.000000e+00> : vector<4x512xf32>
    %156 = tpu.matmul %154, %155, %cst_102 {dimension_numbers = #tpu.dot_dimension_numbers<[1], [0], [0], [1], [0, 0, 1, 1], [], []>} : vector<4x8xf32>, vector<8x512xf32>, vector<4x512xf32> -> vector<4x512xf32>
    %157 = arith.addf %145, %156 : vector<4x512xf32>
    %c0_103 = arith.constant 0 : index
    %c273 = arith.constant 273 : index
    %158 = vector.load %arg15[%c0_103, %c273] : memref<8x1280xf32, #tpu.memory_space<vmem>>, vector<8x512xf32>
    %c-1_i32 = arith.constant -1 : i32
    %159 = vector.broadcast %c-1_i32 : i32 to vector<4x8xi32>
    %160 = arith.subi %131, %159 : vector<4x8xi32>
    %161 = arith.cmpi eq, %132, %160 : vector<4x8xi32>
    %c4_i32_104 = arith.constant 4 : i32
    %162 = vector.broadcast %c4_i32_104 : i32 to vector<4x8xi32>
    %163 = arith.cmpi slt, %132, %162 : vector<4x8xi32>
    %164 = arith.andi %161, %163 : vector<4x8xi1>
    %165 = arith.extui %164 : vector<4x8xi1> to vector<4x8xi32>
    %166 = arith.sitofp %165 : vector<4x8xi32> to vector<4x8xf32>
    %167 = arith.mulf %158, %130 : vector<8x512xf32>
    %cst_105 = arith.constant dense<0.000000e+00> : vector<4x512xf32>
    %168 = tpu.matmul %166, %167, %cst_105 {dimension_numbers = #tpu.dot_dimension_numbers<[1], [0], [0], [1], [0, 0, 1, 1], [], []>} : vector<4x8xf32>, vector<8x512xf32>, vector<4x512xf32> -> vector<4x512xf32>
    %169 = arith.addf %157, %168 : vector<4x512xf32>
    %c0_106 = arith.constant 0 : index
    %c373 = arith.constant 373 : index
    %170 = vector.load %arg15[%c0_106, %c373] : memref<8x1280xf32, #tpu.memory_space<vmem>>, vector<8x512xf32>
    %c0_i32 = arith.constant 0 : i32
    %171 = vector.broadcast %c0_i32 : i32 to vector<4x8xi32>
    %172 = arith.subi %131, %171 : vector<4x8xi32>
    %173 = arith.cmpi eq, %132, %172 : vector<4x8xi32>
    %c4_i32_107 = arith.constant 4 : i32
    %174 = vector.broadcast %c4_i32_107 : i32 to vector<4x8xi32>
    %175 = arith.cmpi slt, %132, %174 : vector<4x8xi32>
    %176 = arith.andi %173, %175 : vector<4x8xi1>
    %177 = arith.extui %176 : vector<4x8xi1> to vector<4x8xi32>
    %178 = arith.sitofp %177 : vector<4x8xi32> to vector<4x8xf32>
    %179 = arith.mulf %170, %130 : vector<8x512xf32>
    %cst_108 = arith.constant dense<0.000000e+00> : vector<4x512xf32>
    %180 = tpu.matmul %178, %179, %cst_108 {dimension_numbers = #tpu.dot_dimension_numbers<[1], [0], [0], [1], [0, 0, 1, 1], [], []>} : vector<4x8xf32>, vector<8x512xf32>, vector<4x512xf32> -> vector<4x512xf32>
    %181 = arith.addf %169, %180 : vector<4x512xf32>
    %c0_109 = arith.constant 0 : index
    %c473 = arith.constant 473 : index
    %182 = vector.load %arg15[%c0_109, %c473] : memref<8x1280xf32, #tpu.memory_space<vmem>>, vector<8x512xf32>
    %c1_i32 = arith.constant 1 : i32
    %183 = vector.broadcast %c1_i32 : i32 to vector<4x8xi32>
    %184 = arith.subi %131, %183 : vector<4x8xi32>
    %185 = arith.cmpi eq, %132, %184 : vector<4x8xi32>
    %c4_i32_110 = arith.constant 4 : i32
    %186 = vector.broadcast %c4_i32_110 : i32 to vector<4x8xi32>
    %187 = arith.cmpi slt, %132, %186 : vector<4x8xi32>
    %188 = arith.andi %185, %187 : vector<4x8xi1>
    %189 = arith.extui %188 : vector<4x8xi1> to vector<4x8xi32>
    %190 = arith.sitofp %189 : vector<4x8xi32> to vector<4x8xf32>
    %191 = arith.mulf %182, %130 : vector<8x512xf32>
    %cst_111 = arith.constant dense<0.000000e+00> : vector<4x512xf32>
    %192 = tpu.matmul %190, %191, %cst_111 {dimension_numbers = #tpu.dot_dimension_numbers<[1], [0], [0], [1], [0, 0, 1, 1], [], []>} : vector<4x8xf32>, vector<8x512xf32>, vector<4x512xf32> -> vector<4x512xf32>
    %193 = arith.addf %181, %192 : vector<4x512xf32>
    %c0_112 = arith.constant 0 : index
    %c573 = arith.constant 573 : index
    %194 = vector.load %arg15[%c0_112, %c573] : memref<8x1280xf32, #tpu.memory_space<vmem>>, vector<8x512xf32>
    %c2_i32 = arith.constant 2 : i32
    %195 = vector.broadcast %c2_i32 : i32 to vector<4x8xi32>
    %196 = arith.subi %131, %195 : vector<4x8xi32>
    %197 = arith.cmpi eq, %132, %196 : vector<4x8xi32>
    %c4_i32_113 = arith.constant 4 : i32
    %198 = vector.broadcast %c4_i32_113 : i32 to vector<4x8xi32>
    %199 = arith.cmpi slt, %132, %198 : vector<4x8xi32>
    %200 = arith.andi %197, %199 : vector<4x8xi1>
    %201 = arith.extui %200 : vector<4x8xi1> to vector<4x8xi32>
    %202 = arith.sitofp %201 : vector<4x8xi32> to vector<4x8xf32>
    %203 = arith.mulf %194, %130 : vector<8x512xf32>
    %cst_114 = arith.constant dense<0.000000e+00> : vector<4x512xf32>
    %204 = tpu.matmul %202, %203, %cst_114 {dimension_numbers = #tpu.dot_dimension_numbers<[1], [0], [0], [1], [0, 0, 1, 1], [], []>} : vector<4x8xf32>, vector<8x512xf32>, vector<4x512xf32> -> vector<4x512xf32>
    %205 = arith.addf %193, %204 : vector<4x512xf32>
    %c0_115 = arith.constant 0 : index
    %c673 = arith.constant 673 : index
    %206 = vector.load %arg15[%c0_115, %c673] : memref<8x1280xf32, #tpu.memory_space<vmem>>, vector<8x512xf32>
    %c3_i32 = arith.constant 3 : i32
    %207 = vector.broadcast %c3_i32 : i32 to vector<4x8xi32>
    %208 = arith.subi %131, %207 : vector<4x8xi32>
    %209 = arith.cmpi eq, %132, %208 : vector<4x8xi32>
    %c4_i32_116 = arith.constant 4 : i32
    %210 = vector.broadcast %c4_i32_116 : i32 to vector<4x8xi32>
    %211 = arith.cmpi slt, %132, %210 : vector<4x8xi32>
    %212 = arith.andi %209, %211 : vector<4x8xi1>
    %213 = arith.extui %212 : vector<4x8xi1> to vector<4x8xi32>
    %214 = arith.sitofp %213 : vector<4x8xi32> to vector<4x8xf32>
    %215 = arith.mulf %206, %130 : vector<8x512xf32>
    %cst_117 = arith.constant dense<0.000000e+00> : vector<4x512xf32>
    %216 = tpu.matmul %214, %215, %cst_117 {dimension_numbers = #tpu.dot_dimension_numbers<[1], [0], [0], [1], [0, 0, 1, 1], [], []>} : vector<4x8xf32>, vector<8x512xf32>, vector<4x512xf32> -> vector<4x512xf32>
    %217 = arith.addf %205, %216 : vector<4x512xf32>
    %218 = vector.extract_strided_slice %217 {offsets = [0, 0], sizes = [4, 384], strides = [1, 1]} : vector<4x512xf32> to vector<4x384xf32>
    %c0_118 = arith.constant 0 : index
    %c0_119 = arith.constant 0 : index
    %219 = vector.load %arg17[%c0_118, %c0_119] : memref<40x384xf32, #tpu.memory_space<vmem>>, vector<4x384xf32>
    tpu.vector_store %arg17[%c0_118, %c0_119], %218 {strides = array<i32>} : memref<40x384xf32, #tpu.memory_space<vmem>>, vector<4x384xf32>,
    %220 = vector.extract_strided_slice %217 {offsets = [0, 1], sizes = [4, 384], strides = [1, 1]} : vector<4x512xf32> to vector<4x384xf32>
    %c4_120 = arith.constant 4 : index
    %c0_121 = arith.constant 0 : index
    %221 = vector.load %arg17[%c4_120, %c0_121] : memref<40x384xf32, #tpu.memory_space<vmem>>, vector<4x384xf32>
    tpu.vector_store %arg17[%c4_120, %c0_121], %220 {strides = array<i32>} : memref<40x384xf32, #tpu.memory_space<vmem>>, vector<4x384xf32>,
    %222 = vector.extract_strided_slice %217 {offsets = [0, 2], sizes = [4, 384], strides = [1, 1]} : vector<4x512xf32> to vector<4x384xf32>
    %c8_122 = arith.constant 8 : index
    %c0_123 = arith.constant 0 : index
    %223 = vector.load %arg17[%c8_122, %c0_123] : memref<40x384xf32, #tpu.memory_space<vmem>>, vector<4x384xf32>
    tpu.vector_store %arg17[%c8_122, %c0_123], %222 {strides = array<i32>} : memref<40x384xf32, #tpu.memory_space<vmem>>, vector<4x384xf32>,
    %224 = vector.extract_strided_slice %217 {offsets = [0, 10], sizes = [4, 384], strides = [1, 1]} : vector<4x512xf32> to vector<4x384xf32>
    %c12_124 = arith.constant 12 : index
    %c0_125 = arith.constant 0 : index
    %225 = vector.load %arg17[%c12_124, %c0_125] : memref<40x384xf32, #tpu.memory_space<vmem>>, vector<4x384xf32>
    tpu.vector_store %arg17[%c12_124, %c0_125], %224 {strides = array<i32>} : memref<40x384xf32, #tpu.memory_space<vmem>>, vector<4x384xf32>,
    %226 = vector.extract_strided_slice %217 {offsets = [0, 11], sizes = [4, 384], strides = [1, 1]} : vector<4x512xf32> to vector<4x384xf32>
    %c16_126 = arith.constant 16 : index
    %c0_127 = arith.constant 0 : index
    %227 = vector.load %arg17[%c16_126, %c0_127] : memref<40x384xf32, #tpu.memory_space<vmem>>, vector<4x384xf32>
    tpu.vector_store %arg17[%c16_126, %c0_127], %226 {strides = array<i32>} : memref<40x384xf32, #tpu.memory_space<vmem>>, vector<4x384xf32>,
    %228 = vector.extract_strided_slice %217 {offsets = [0, 12], sizes = [4, 384], strides = [1, 1]} : vector<4x512xf32> to vector<4x384xf32>
    %c20_128 = arith.constant 20 : index
    %c0_129 = arith.constant 0 : index
    %229 = vector.load %arg17[%c20_128, %c0_129] : memref<40x384xf32, #tpu.memory_space<vmem>>, vector<4x384xf32>
    tpu.vector_store %arg17[%c20_128, %c0_129], %228 {strides = array<i32>} : memref<40x384xf32, #tpu.memory_space<vmem>>, vector<4x384xf32>,
    %230 = vector.extract_strided_slice %217 {offsets = [0, 20], sizes = [4, 384], strides = [1, 1]} : vector<4x512xf32> to vector<4x384xf32>
    %c24_130 = arith.constant 24 : index
    %c0_131 = arith.constant 0 : index
    %231 = vector.load %arg17[%c24_130, %c0_131] : memref<40x384xf32, #tpu.memory_space<vmem>>, vector<4x384xf32>
    tpu.vector_store %arg17[%c24_130, %c0_131], %230 {strides = array<i32>} : memref<40x384xf32, #tpu.memory_space<vmem>>, vector<4x384xf32>,
    %232 = vector.extract_strided_slice %217 {offsets = [0, 21], sizes = [4, 384], strides = [1, 1]} : vector<4x512xf32> to vector<4x384xf32>
    %c28_132 = arith.constant 28 : index
    %c0_133 = arith.constant 0 : index
    %233 = vector.load %arg17[%c28_132, %c0_133] : memref<40x384xf32, #tpu.memory_space<vmem>>, vector<4x384xf32>
    tpu.vector_store %arg17[%c28_132, %c0_133], %232 {strides = array<i32>} : memref<40x384xf32, #tpu.memory_space<vmem>>, vector<4x384xf32>,
    %234 = vector.extract_strided_slice %217 {offsets = [0, 22], sizes = [4, 384], strides = [1, 1]} : vector<4x512xf32> to vector<4x384xf32>
    %c32_134 = arith.constant 32 : index
    %c0_135 = arith.constant 0 : index
    %235 = vector.load %arg17[%c32_134, %c0_135] : memref<40x384xf32, #tpu.memory_space<vmem>>, vector<4x384xf32>
    tpu.vector_store %arg17[%c32_134, %c0_135], %234 {strides = array<i32>} : memref<40x384xf32, #tpu.memory_space<vmem>>, vector<4x384xf32>,
    %cst_136 = arith.constant 0.000000e+00 : f32
    %236 = vector.broadcast %cst_136 : f32 to vector<4x384xf32>
    %c36_137 = arith.constant 36 : index
    %c0_138 = arith.constant 0 : index
    %237 = vector.load %arg17[%c36_137, %c0_138] : memref<40x384xf32, #tpu.memory_space<vmem>>, vector<4x384xf32>
    tpu.vector_store %arg17[%c36_137, %c0_138], %236 {strides = array<i32>} : memref<40x384xf32, #tpu.memory_space<vmem>>, vector<4x384xf32>,
    %c0_139 = arith.constant 0 : index
    %c0_140 = arith.constant 0 : index
    %238 = vector.load %arg7[%c0_139, %c0_140] : memref<8x40xf32, #tpu.memory_space<vmem>>, vector<8x40xf32>
    %c0_141 = arith.constant 0 : index
    %c0_142 = arith.constant 0 : index
    %239 = vector.load %arg17[%c0_141, %c0_142] : memref<40x384xf32, #tpu.memory_space<vmem>>, vector<40x384xf32>
    %cst_143 = arith.constant dense<0.000000e+00> : vector<8x384xf32>
    %240 = tpu.matmul %238, %239, %cst_143 {dimension_numbers = #tpu.dot_dimension_numbers<[1], [0], [0], [1], [0, 0, 1, 1], [], []>} : vector<8x40xf32>, vector<40x384xf32>, vector<8x384xf32> -> vector<8x384xf32>
    %c0_144 = arith.constant 0 : index
    %c0_145 = arith.constant 0 : index
    %241 = vector.load %arg8[%c0_144, %c0_145] : memref<8x1xf32, #tpu.memory_space<vmem>>, vector<8x1xf32>
    %242 = vector.broadcast %241 : vector<8x1xf32> to vector<8x384xf32>
    %243 = arith.addf %240, %242 : vector<8x384xf32>
    %c0_146 = arith.constant 0 : index
    %c0_147 = arith.constant 0 : index
    %244 = vector.load %arg13[%c0_146, %c0_147] : memref<1x384xf32, #tpu.memory_space<vmem>>, vector<1x384xf32>
    %245 = vector.broadcast %244 : vector<1x384xf32> to vector<8x384xf32>
    %246 = arith.mulf %243, %245 : vector<8x384xf32>
    %cst_148 = arith.constant dense<0.000000e+00> : vector<8xf32>
    %247 = vector.multi_reduction <add>, %246, %cst_148 [1] : vector<8x384xf32> to vector<8xf32>
    %248 = vector.shape_cast %247 : vector<8xf32> to vector<8x1xf32>
    %cst_149 = arith.constant 2.560000e+02 : f32
    %249 = vector.broadcast %cst_149 : f32 to vector<8x1xf32>
    %250 = arith.divf %248, %249 : vector<8x1xf32>
    %251 = vector.broadcast %250 : vector<8x1xf32> to vector<8x384xf32>
    %252 = arith.subf %243, %251 : vector<8x384xf32>
    %253 = arith.mulf %252, %252 : vector<8x384xf32>
    %254 = vector.broadcast %244 : vector<1x384xf32> to vector<8x384xf32>
    %255 = arith.mulf %253, %254 : vector<8x384xf32>
    %cst_150 = arith.constant dense<0.000000e+00> : vector<8xf32>
    %256 = vector.multi_reduction <add>, %255, %cst_150 [1] : vector<8x384xf32> to vector<8xf32>
    %257 = vector.shape_cast %256 : vector<8xf32> to vector<8x1xf32>
    %cst_151 = arith.constant 2.560000e+02 : f32
    %258 = vector.broadcast %cst_151 : f32 to vector<8x1xf32>
    %259 = arith.divf %257, %258 : vector<8x1xf32>
    %cst_152 = arith.constant 9.99999974E-6 : f32
    %260 = vector.broadcast %cst_152 : f32 to vector<8x1xf32>
    %261 = arith.addf %259, %260 : vector<8x1xf32>
    %262 = math.rsqrt %261 : vector<8x1xf32>
    %263 = vector.broadcast %262 : vector<8x1xf32> to vector<8x384xf32>
    %264 = arith.mulf %252, %263 : vector<8x384xf32>
    %c0_153 = arith.constant 0 : index
    %c0_154 = arith.constant 0 : index
    %265 = vector.load %arg9[%c0_153, %c0_154] : memref<8x1xf32, #tpu.memory_space<vmem>>, vector<8x1xf32>
    %266 = vector.broadcast %265 : vector<8x1xf32> to vector<8x384xf32>
    %267 = arith.mulf %264, %266 : vector<8x384xf32>
    %c0_155 = arith.constant 0 : index
    %c0_156 = arith.constant 0 : index
    %268 = vector.load %arg10[%c0_155, %c0_156] : memref<8x1xf32, #tpu.memory_space<vmem>>, vector<8x1xf32>
    %269 = vector.broadcast %268 : vector<8x1xf32> to vector<8x384xf32>
    %270 = arith.addf %267, %269 : vector<8x384xf32>
    %cst_157 = arith.constant 0.000000e+00 : f32
    %271 = vector.broadcast %cst_157 : f32 to vector<8x384xf32>
    %272 = arith.maximumf %270, %271 : vector<8x384xf32>
    %c0_158 = arith.constant 0 : index
    %c0_159 = arith.constant 0 : index
    %273 = vector.load %arg14[%c0_158, %c0_159] : memref<8x384xf32, #tpu.memory_space<vmem>>, vector<8x384xf32>
    tpu.vector_store %arg14[%c0_158, %c0_159], %272 {strides = array<i32>} : memref<8x384xf32, #tpu.memory_space<vmem>>, vector<8x384xf32>,
    return
  }
}

</mosaic_0001>

<bundles_post_ra>
// kernel: conv3d_block_forward.1
= control target key start
LH: loop header
LB: loop body
LE: loop exit
PB: predicated region body
PF: predicated region fallthrough
CT: control target
= control target key end

     0   :  { %v53_v0 = vlaneseq  ;;  %v3490_v1 = vmov 1983009808   ;;  %s3491_s19 = smov 126   ;;  %s3493_s20 = smov 118   ;;  %v3498_v28 = vmov 0.0|0.0   ;;  %vm135_vm0 = vcmask 1031168   ;;  %s4439_s0 = inlined_call_operand.vmem [shape: f32[2,640], index: 0, kind: input, shape index: {}]   ;;  %s4440_s2 = inlined_call_operand.vmem [shape: f32[8,1], index: 2, kind: input, shape index: {}]   ;;  %s4441_s1 = inlined_call_operand.vmem [shape: f32[8,56], index: 1, kind: input, shape index: {}]   ;;  %s4442_s5 = inlined_call_operand.vmem [shape: s32[1,384], index: 5, kind: input, shape index: {}]   ;;  %s4443_s6 = inlined_call_operand.vmem [shape: f32[1,384], index: 6, kind: input, shape index: {}, may-alias: {6,13}]   ;;  %s4444_s11 = inlined_call_operand.vmem [shape: s32[1,512], index: 11, kind: input, shape index: {}]   ;;  %s4445_s12 = inlined_call_operand.vmem [shape: f32[1,512], index: 12, kind: input, shape index: {}]   ;;  %s4446_s3 = inlined_call_operand.vmem [shape: f32[4,1], index: 3, kind: input, shape index: {}]   ;;  %s4447_s4 = inlined_call_operand.vmem [shape: f32[4,1], index: 4, kind: input, shape index: {}]   ;;  %s4448_s8 = inlined_call_operand.vmem [shape: f32[8,1], index: 8, kind: input, shape index: {}]   ;;  %s4449_s7 = inlined_call_operand.vmem [shape: f32[8,40], index: 7, kind: input, shape index: {}]   ;;  %s4450_s13 = inlined_call_operand.vmem [shape: f32[1,384], index: 13, kind: input, shape index: {}, may-alias: {6,13}]   ;;  %s4451_s9 = inlined_call_operand.vmem [shape: f32[8,1], index: 9, kind: input, shape index: {}]   ;;  %s4452_s10 = inlined_call_operand.vmem [shape: f32[8,1], index: 10, kind: input, shape index: {}]   ;;  %s4453_s14 = inlined_call_operand.vmem [shape: f32[8,384], index: 14, kind: output, shape index: {}]  }
   0x1   :  { %v51_v2 = vunpack.c.l.s4 %v3490_v1  ;;  %v108_v3 = vld [vmem:[%s4439_s0] sm:$0xff]  ;;  %s3494_s21 = smov 117   ;;  %s3495_s22 = smov 116   ;;  %3392 = vmatprep.subr.bf16.mxu1 %v3498_v28  ;;  %vm172_vm1 = vcmask 965632   ;;  %vm98_vm2 = vcmask 1039360   ;;  %vm209_vm3 = vcmask 957440  }
   0x2   :  { %v47_v4 = vld [vmem:[%s4439_s0] sm:$0x3f]  ;;  %v3613_v5 = vshrl.u32 %v53_v0, 7  ;;  %v110_v8 = vcombine.high %v108_v3, %v108_v3  ;;  %v73_v11 = vcombine.low %v108_v3, %v108_v3  ;;  %s3496_s23 = smov 108   ;;  %s3497_s24 = smov 107   ;;  %vm4456_vm4 = vcmask 949248  }
   0x3   :  { %v700_v6 = vld [vmem:[%s4439_s0 + $0x2] sm:$0xff]  ;;  %3296 = vst.sshfl [vmem:[#allocation3] sm:$0x3 pattern:$0x76325410] %v47_v4  ;;  %v52_v7 = vunpack.c.0.s8 %v51_v2  ;;  %s3492_s0 = smov 127   ;;  %v49_v26 = vcombine.high %v47_v4, %v47_v4 }
   0x4   :  { %v702_v9 = vcombine.high %v700_v6, %v700_v6  ;;  %v739_v21 = vcombine.low %v700_v6, %v700_v6  ;;  %s3499_s25 = smov 106   ;;  %s3500_s26 = smov 28   ;;  %vm283_vm5 = vcmask 883712   ;;  %vm4455_vm6 = vcmask 875520  }
   0x5   :  { %v55_v10 = vsub.s32 %v52_v7, %v3613_v5  ;;  %3297 = vst.sshfl [vmem:[#allocation3 + $0x10] sm:$0x3 pattern:$0x76325410] %v49_v26  ;;  %s3501_s27 = smov 27   ;;  %s3502_s28 = smov 26  }
   0x6   :  { %s3503_s29 = smov 18   ;;  %s3504_s30 = smov 17   ;;  %vm4454_vm7 = vcmask 867328   ;;  %vm394_vm8 = vcmask 228352   ;;  %vm431_vm9 = vcmask 220160   ;;  %vm468_vm10 = vcmask 211968  }
   0x7   :  { %v3619_v12 = vrot.slane %v108_v3, %v55_v10  ;;  %v3621_v13 = vrot.slane %v110_v8, %v55_v10  ;;  %v3623_v14 = vrot.slane %v702_v9, %v55_v10  ;;  %v3625_v15 = vrot.slane %v700_v6, %v55_v10  ;;  %s3505_s15 = smov 16   ;;  %s3506_s16 = smov 8  }
   0x8   :  { %v3631_v16 = vrot.slane %v73_v11, %v55_v10  ;;  %v56_v18 = vrot.slane %v47_v4, %v55_v10  ;;  %v3649_v23 = vrot.slane %v739_v21, %v55_v10  ;;  %s3507_s17 = smov 7   ;;  %s3508_s18 = smov 6   ;;  %vm505_vm11 = vcmask 146432  }
   0x9   :  { %129 = vrot.lane.b32.xlu1 %v3619_v12, %s3491_s19  ;;  %94 = vrot.lane.b32.xlu0 %v3619_v12, %s3492_s0  ;;  %v3635_v17 = vcombine.low %v3621_v13, %v3621_v13  ;;  %v3639_v19 = vcombine.low %v3619_v12, %v3619_v12  ;;  %v3657_v24 = vcombine.high %v3619_v12, %v3619_v12  ;;  %vm542_vm12 = vcmask 138240  }
   0xa   :  { %v3647_v20 = vcombine.high %v3631_v16, %v3631_v16  ;;  %v64_v22 = vcombine.high %v56_v18, %v56_v18  ;;  %v162_v25 = vcombine.low %v3631_v16, %v3631_v16  ;;  %v3697_v27 = vcombine.high %v3621_v13, %v3621_v13 }
   0xb   :  { %v3771_v38 = vcombine.low %v3623_v14, %v3623_v14  ;;  %v3783_v42 = vcombine.low %v3625_v15, %v3625_v15  ;;  %v3795_v46 = vcombine.high %v3625_v15, %v3625_v15  ;;  %v3807_v50 = vcombine.high %v3649_v23, %v3649_v23 }
   0xc   :  { %69 = vst [vmem:[#allocation3 + $0x8] sm:$0x3] %v64_v22  ;;  %v754_v7 = vcombine.low %v3649_v23, %v3649_v23  ;;  %vm579_vm13 = vcmask 130048   ;;  %vm616_vm14 = vcmask 64512   ;;  %vm3519_vm15 = vmmov 0  }
   0xd   :  { %131 = vrot.lane.b32.xlu1 %v3635_v17, %s3491_s19  ;;  %166 = vrot.lane.b32.xlu0 %v3631_v16, %s3493_s20 }
  0x11   :  { %168 = vrot.lane.b32.xlu1 %v3639_v19, %s3493_s20  ;;  %92 = vrot.lane.b32.xlu0 %v3647_v20, %s3492_s0 }
  0x15   :  { %205 = vrot.lane.b32.xlu1 %v3621_v13, %s3494_s21  ;;  %203 = vrot.lane.b32.xlu0 %v3657_v24, %s3494_s21 }
  0x19   :  { %242 = vrot.lane.b32.xlu1 %v3619_v12, %s3495_s22  ;;  %240 = vrot.lane.b32.xlu0 %v3647_v20, %s3495_s22 }
  0x1d   :  { %279 = vrot.lane.b32.xlu1 %v3635_v17, %s3496_s23  ;;  %277 = vrot.lane.b32.xlu0 %v3619_v12, %s3496_s23 }
  0x21   :  { %316 = vrot.lane.b32.xlu1 %v3639_v19, %s3497_s24  ;;  %314 = vrot.lane.b32.xlu0 %v3631_v16, %s3497_s24 }
  0x25   :  { %127 = vrot.lane.b32.xlu1 %v3639_v19, %s3491_s19  ;;  %90 = vrot.lane.b32.xlu0 %v3631_v16, %s3492_s0 }
  0x29   :  { %201 = vrot.lane.b32.xlu1 %v3619_v12, %s3494_s21  ;;  %164 = vrot.lane.b32.xlu0 %v162_v25, %s3493_s20 }
  0x2d   :  { %275 = vrot.lane.b32.xlu1 %v3639_v19, %s3496_s23  ;;  %238 = vrot.lane.b32.xlu0 %v3631_v16, %s3495_s22 }
  0x31   :  { %96 = vrot.lane.b32.xlu1 %v3657_v24, %s3492_s0  ;;  %312 = vrot.lane.b32.xlu0 %v162_v25, %s3497_s24 }
  0x35   :  { %170 = vrot.lane.b32.xlu1 %v3619_v12, %s3493_s20  ;;  %133 = vrot.lane.b32.xlu0 %v3621_v13, %s3491_s19 }
  0x39   :  { %244 = vrot.lane.b32.xlu1 %v3657_v24, %s3495_s22  ;;  %207 = vrot.lane.b32.xlu0 %v3697_v27, %s3494_s21 }
  0x3d   :  { %318 = vrot.lane.b32.xlu1 %v3619_v12, %s3497_s24  ;;  %281 = vrot.lane.b32.xlu0 %v3621_v13, %s3496_s23 }
  0x41   :  { %353 = vrot.lane.b32.xlu1 %v3621_v13, %s3499_s25  ;;  %351 = vrot.lane.b32.xlu0 %v3657_v24, %s3499_s25 }
  0x45   :  { %390 = vrot.lane.b32.xlu1 %v3619_v12, %s3500_s26  ;;  %388 = vrot.lane.b32.xlu0 %v3647_v20, %s3500_s26 }
  0x49   :  { %427 = vrot.lane.b32.xlu1 %v3635_v17, %s3501_s27  ;;  %425 = vrot.lane.b32.xlu0 %v3619_v12, %s3501_s27 }
  0x4d   :  { %464 = vrot.lane.b32.xlu1 %v3639_v19, %s3502_s28  ;;  %462 = vrot.lane.b32.xlu0 %v3631_v16, %s3502_s28 }
  0x51   :  { %501 = vrot.lane.b32.xlu1 %v3621_v13, %s3503_s29  ;;  %499 = vrot.lane.b32.xlu0 %v3657_v24, %s3503_s29 }
  0x55   :  { %538 = vrot.lane.b32.xlu1 %v3619_v12, %s3504_s30  ;;  %536 = vrot.lane.b32.xlu0 %v3647_v20, %s3504_s30 }
  0x59   :  { %575 = vrot.lane.b32.xlu1 %v3635_v17, %s3505_s15  ;;  %573 = vrot.lane.b32.xlu0 %v3619_v12, %s3505_s15 }
  0x5d   :  { %612 = vrot.lane.b32.xlu1 %v3639_v19, %s3506_s16  ;;  %610 = vrot.lane.b32.xlu0 %v3631_v16, %s3506_s16 }
  0x61   :  { %386 = vrot.lane.b32.xlu1 %v3631_v16, %s3500_s26  ;;  %349 = vrot.lane.b32.xlu0 %v3619_v12, %s3499_s25 }
  0x65   :  { %460 = vrot.lane.b32.xlu1 %v162_v25, %s3502_s28  ;;  %423 = vrot.lane.b32.xlu0 %v3639_v19, %s3501_s27 }
  0x69   :  { %534 = vrot.lane.b32.xlu1 %v3631_v16, %s3504_s30  ;;  %497 = vrot.lane.b32.xlu0 %v3619_v12, %s3503_s29 }
  0x6d   :  { %608 = vrot.lane.b32.xlu1 %v162_v25, %s3506_s16  ;;  %571 = vrot.lane.b32.xlu0 %v3639_v19, %s3505_s15 }
  0x71   :  { %392 = vrot.lane.b32.xlu1 %v3657_v24, %s3500_s26  ;;  %355 = vrot.lane.b32.xlu0 %v3697_v27, %s3499_s25  ;;  %s3509_s26 = smov 56  }
  0x75   :  { %466 = vrot.lane.b32.xlu1 %v3619_v12, %s3502_s28  ;;  %429 = vrot.lane.b32.xlu0 %v3621_v13, %s3501_s27  ;;  %s3510_s27 = smov 55   ;;  %s3511_s28 = smov 54  }
  0x79   :  { %540 = vrot.lane.b32.xlu1 %v3657_v24, %s3504_s30  ;;  %503 = vrot.lane.b32.xlu0 %v3697_v27, %s3503_s29  ;;  %s3512_s29 = smov 46  }
  0x7b   :  { %v130_v29 = vpop.permute.xlu1 %129  ;;  %v3744_v30 = vpop.permute.xlu0 %94 }
  0x7d   :  { %614 = vrot.lane.b32.xlu1 %v3619_v12, %s3506_s16  ;;  %577 = vrot.lane.b32.xlu0 %v3621_v13, %s3505_s15  ;;  %s3513_s15 = smov 45   ;;  %s3514_s16 = smov 44  }
  0x7f   :  { %v3748_v31 = vpop.permute.xlu1 %131  ;;  %v3750_v32 = vpop.permute.xlu0 %166 }
  0x80   :  { %v137_v33 = vsel %vm135_vm0, %v130_v29, %v3748_v31 }
  0x81   :  { %143 = vst [vmem:[#allocation3 + $0x8] sm:$0x30] %v137_v33  ;;  %649 = vrot.lane.b32.xlu1 %v3621_v13, %s3507_s17  ;;  %647 = vrot.lane.b32.xlu0 %v3657_v24, %s3507_s17 }
  0x83   :  { %v3758_v34 = vpop.permute.xlu1 %168  ;;  %v93_v35 = vpop.permute.xlu0 %92 }
  0x84   :  { %v174_v36 = vsel %vm172_vm1, %v3750_v32, %v3758_v34  ;;  %v100_v37 = vsel %vm98_vm2, %v93_v35, %v3744_v30 }
  0x85   :  { %180 = vst [vmem:[#allocation3 + $0x8] sm:$0xc0] %v174_v36  ;;  %106 = vst [vmem:[#allocation3 + $0x8] sm:$0xc] %v100_v37  ;;  %686 = vrot.lane.b32.xlu1 %v3619_v12, %s3508_s18  ;;  %684 = vrot.lane.b32.xlu0 %v3647_v20, %s3508_s18 }
  0x87   :  { %v3773_v39 = vpop.permute.xlu1 %205  ;;  %v204_v40 = vpop.permute.xlu0 %203 }
  0x88   :  { %v211_v41 = vsel %vm209_vm3, %v204_v40, %v3773_v39 }
  0x89   :  { %217 = vst [vmem:[#allocation3 + $0x20] sm:$0x3] %v211_v41  ;;  %723 = vrot.lane.b32.xlu1 %v3771_v38, %s3509_s26  ;;  %721 = vrot.lane.b32.xlu0 %v3625_v15, %s3509_s26 }
  0x8b   :  { %v3785_v43 = vpop.permute.xlu1 %242  ;;  %v241_v44 = vpop.permute.xlu0 %240 }
  0x8c   :  { %v248_v45 = vsel %vm4456_vm4, %v241_v44, %v3785_v43  ;;  %v1038_v62 = vld [vmem:[#allocation3 + $0x8] sm:$0xff] }
  0x8d   :  { %254 = vst [vmem:[#allocation3 + $0x20] sm:$0xc] %v248_v45  ;;  %760 = vrot.lane.b32.xlu1 %v3783_v42, %s3510_s27  ;;  %758 = vrot.lane.b32.xlu0 %v3649_v23, %s3510_s27 }
  0x8f   :  { %v3797_v47 = vpop.permute.xlu1 %279  ;;  %v278_v48 = vpop.permute.xlu0 %277 }
  0x90   :  { %v285_v49 = vsel %vm283_vm5, %v278_v48, %v3797_v47 }
  0x91   :  { %291 = vst [vmem:[#allocation3 + $0x20] sm:$0x30] %v285_v49  ;;  %797 = vrot.lane.b32.xlu1 %v3623_v14, %s3511_s28  ;;  %795 = vrot.lane.b32.xlu0 %v3795_v46, %s3511_s28 }
  0x93   :  { %v3809_v51 = vpop.permute.xlu1 %316  ;;  %v315_v52 = vpop.permute.xlu0 %314 }
  0x94   :  { %v322_v53 = vsel %vm4455_vm6, %v315_v52, %v3809_v51 }
  0x95   :  { %328 = vst [vmem:[#allocation3 + $0x20] sm:$0xc0] %v322_v53  ;;  %834 = vrot.lane.b32.xlu1 %v3625_v15, %s3512_s29  ;;  %832 = vrot.lane.b32.xlu0 %v3807_v50, %s3512_s29 }
  0x97   :  { %v128_v54 = vpop.permute.xlu1 %127  ;;  %v91_v55 = vpop.permute.xlu0 %90 }
  0x98   :  { %v136_v56 = vsel %vm135_vm0, %v128_v54, %v130_v29  ;;  %v99_v57 = vsel %vm98_vm2, %v91_v55, %v93_v35 }
  0x99   :  { %142 = vst [vmem:[#allocation3] sm:$0x30] %v136_v56  ;;  %105 = vst [vmem:[#allocation3] sm:$0xc] %v99_v57  ;;  %871 = vrot.lane.b32.xlu1 %v3771_v38, %s3513_s15  ;;  %869 = vrot.lane.b32.xlu0 %v3625_v15, %s3513_s15 }
  0x9b   :  { %v202_v58 = vpop.permute.xlu1 %201  ;;  %v165_v59 = vpop.permute.xlu0 %164 }
  0x9c   :  { %v210_v60 = vsel %vm209_vm3, %v202_v58, %v204_v40  ;;  %v173_v61 = vsel %vm172_vm1, %v165_v59, %v3750_v32  ;;  %v1041_v63 = vld [vmem:[#allocation3 + $0x20] sm:$0xff] }
  0x9d   :  { %216 = vst [vmem:[#allocation3 + $0x18] sm:$0x3] %v210_v60  ;;  %179 = vst [vmem:[#allocation3] sm:$0xc0] %v173_v61  ;;  %908 = vrot.lane.b32.xlu1 %v3783_v42, %s3514_s16  ;;  %906 = vrot.lane.b32.xlu0 %v3649_v23, %s3514_s16  ;;  %v3380_v1 = vpack.c.bf16 %v1041_v63, %v1038_v62 }
  0x9f   :  { %v276_v2 = vpop.permute.xlu1 %275  ;;  %v239_v3 = vpop.permute.xlu0 %238  ;;  %3381 = vmatprep.subr.bf16.mxu0 %v3380_v1 }
  0xa0   :  { %v284_v4 = vsel %vm283_vm5, %v276_v2, %v278_v48  ;;  %v247_v6 = vsel %vm4456_vm4, %v239_v3, %v241_v44 }
  0xa1   :  { %290 = vst [vmem:[#allocation3 + $0x18] sm:$0x30] %v284_v4  ;;  %253 = vst [vmem:[#allocation3 + $0x18] sm:$0xc] %v247_v6  ;;  %682 = vrot.lane.b32.xlu1 %v3631_v16, %s3508_s18  ;;  %645 = vrot.lane.b32.xlu0 %v3619_v12, %s3507_s17 }
  0xa3   :  { %v97_v8 = vpop.permute.xlu1 %96  ;;  %v313_v9 = vpop.permute.xlu0 %312 }
  0xa4   :  { %v101_v10 = vsel %vm98_vm2, %v3744_v30, %v97_v8  ;;  %v321_v11 = vsel %vm4455_vm6, %v313_v9, %v315_v52  ;;  %v1037_v22 = vld [vmem:[#allocation3] sm:$0xff] }
  0xa5   :  { %107 = vst [vmem:[#allocation3 + $0x10] sm:$0xc] %v101_v10  ;;  %327 = vst [vmem:[#allocation3 + $0x18] sm:$0xc0] %v321_v11  ;;  %756 = vrot.lane.b32.xlu1 %v754_v7, %s3510_s27  ;;  %719 = vrot.lane.b32.xlu0 %v3783_v42, %s3509_s26 }
  0xa7   :  { %v171_v13 = vpop.permute.xlu1 %170  ;;  %v134_v16 = vpop.permute.xlu0 %133 }
  0xa8   :  { %v175_v12 = vsel %vm172_vm1, %v3758_v34, %v171_v13  ;;  %v138_v17 = vsel %vm135_vm0, %v3748_v31, %v134_v16 }
  0xa9   :  { %181 = vst [vmem:[#allocation3 + $0x10] sm:$0xc0] %v175_v12  ;;  %144 = vst [vmem:[#allocation3 + $0x10] sm:$0x30] %v138_v17  ;;  %830 = vrot.lane.b32.xlu1 %v3649_v23, %s3512_s29  ;;  %793 = vrot.lane.b32.xlu0 %v3625_v15, %s3511_s28 }
  0xab   :  { %v245_v18 = vpop.permute.xlu1 %244  ;;  %v208_v19 = vpop.permute.xlu0 %207 }
  0xac   :  { %v249_v20 = vsel %vm4456_vm4, %v3785_v43, %v245_v18  ;;  %v212_v21 = vsel %vm209_vm3, %v3773_v39, %v208_v19  ;;  %v1040_v25 = vld [vmem:[#allocation3 + $0x18] sm:$0xff]  ;;  %vm912_vm4 = vcmask 359424  }
  0xad   :  { %255 = vst [vmem:[#allocation3 + $0x28] sm:$0xc] %v249_v20  ;;  %218 = vst [vmem:[#allocation3 + $0x28] sm:$0x3] %v212_v21  ;;  %904 = vrot.lane.b32.xlu1 %v754_v7, %s3514_s16  ;;  %867 = vrot.lane.b32.xlu0 %v3783_v42, %s3513_s15  ;;  %v3382_v26 = vpack.c.bf16 %v1040_v25, %v1037_v22 }
  0xaf   :  { %v319_v29 = vpop.permute.xlu1 %318  ;;  %v282_v30 = vpop.permute.xlu0 %281  ;;  %3383 = vmatpush1.bf16.msra.mxu0 %v3382_v26 }
  0xb0   :  { %v323_v31 = vsel %vm4455_vm6, %v3809_v51, %v319_v29  ;;  %v286_v32 = vsel %vm283_vm5, %v3797_v47, %v282_v30  ;;  %v1039_v39 = vld [vmem:[#allocation3 + $0x10] sm:$0xff]  ;;  %v3515_v47 = vmov 0.0   ;;  %vm875_vm6 = vcmask 367616  }
  0xb1   :  { %329 = vst [vmem:[#allocation3 + $0x28] sm:$0xc0] %v323_v31  ;;  %292 = vst [vmem:[#allocation3 + $0x28] sm:$0x30] %v286_v32  ;;  %688 = vrot.lane.b32.xlu1 %v3657_v24, %s3508_s18  ;;  %651 = vrot.lane.b32.xlu0 %v3697_v27, %s3507_s17  ;;  %v3880_v24 = vcombine.high %v3623_v14, %v3623_v14  ;;  %s3516_s17 = smov 36   ;;  %s3517_s18 = smov 35  }
  0xb2   :  { %1034 = vst [vmem:[#allocation3 + $0x98] sm:$0xc0] %v3515_v47  ;;  %1033 = vst [vmem:[#allocation3 + $0x90] sm:$0xc0] %v3515_v47  ;;  %1131 = vmatprep.mubr.f32.mxu0 %v3515_v47  ;;  %3364 = vmatprep.mubr.msk.f32.mxu1 %vm3519_vm15, %v3515_v47 }
  0xb3   :  { %v3867_v33 = vpop.permute.xlu1 %353  ;;  %v3869_v34 = vpop.permute.xlu0 %351  ;;  %1035 = vst [vmem:[#allocation3 + $0xa0] sm:$0xc0] %v3515_v47  ;;  %3054 = vst [vmem:[#allocation4 + $0x60] sm:$0xf0] %v3515_v47 }
  0xb4   :  { %v359_v35 = vsel %vm4454_vm7, %v3869_v34, %v3867_v33  ;;  %3055 = vst [vmem:[#allocation4 + $0x68] sm:$0xf0] %v3515_v47  ;;  %3056 = vst [vmem:[#allocation4 + $0x70] sm:$0xf0] %v3515_v47 }
  0xb5   :  { %365 = vst [vmem:[#allocation3 + $0x38] sm:$0x3] %v359_v35  ;;  %762 = vrot.lane.b32.xlu1 %v3625_v15, %s3510_s27  ;;  %725 = vrot.lane.b32.xlu0 %v3623_v14, %s3509_s26  ;;  %s3518_s26 = smov 34  }
  0xb7   :  { %v3882_v27 = vpop.permute.xlu1 %390  ;;  %v3884_v36 = vpop.permute.xlu0 %388 }
  0xb8   :  { %v396_v37 = vsel %vm394_vm8, %v3884_v36, %v3882_v27  ;;  %v1042_v40 = vld [vmem:[#allocation3 + $0x28] sm:$0xff] }
  0xb9   :  { %402 = vst [vmem:[#allocation3 + $0x38] sm:$0xc] %v396_v37  ;;  %836 = vrot.lane.b32.xlu1 %v3795_v46, %s3512_s29  ;;  %799 = vrot.lane.b32.xlu0 %v3880_v24, %s3511_s28  ;;  %v3393_v41 = vpack.c.bf16 %v1042_v40, %v1039_v39 }
  0xbb   :  { %v3893_v43 = vpop.permute.xlu1 %427  ;;  %v3895_v44 = vpop.permute.xlu0 %425  ;;  %3394 = vmatpush3.bf16.msra.mxu1 %v3393_v41 }
  0xbc   :  { %v433_v45 = vsel %vm431_vm9, %v3895_v44, %v3893_v43  ;;  %3395 = vmatprep.subr.bf16.mxu1 %v3498_v28 }
  0xbd   :  { %439 = vst [vmem:[#allocation3 + $0x38] sm:$0x30] %v433_v45  ;;  %910 = vrot.lane.b32.xlu1 %v3625_v15, %s3514_s16  ;;  %873 = vrot.lane.b32.xlu0 %v3623_v14, %s3513_s15 }
  0xbf   :  { %v3912_v48 = vpop.permute.xlu1 %464  ;;  %v463_v49 = vpop.permute.xlu0 %462 }
  0xc0   :  { %v470_v51 = vsel %vm468_vm10, %v463_v49, %v3912_v48 }
  0xc1   :  { %476 = vst [vmem:[#allocation3 + $0x38] sm:$0xc0] %v470_v51  ;;  %945 = vrot.lane.b32.xlu1 %v3623_v14, %s3516_s17  ;;  %943 = vrot.lane.b32.xlu0 %v3795_v46, %s3516_s17 }
  0xc3   :  { %v3920_v52 = vpop.permute.xlu1 %501  ;;  %v500_v53 = vpop.permute.xlu0 %499 }
  0xc4   :  { %v507_v54 = vsel %vm505_vm11, %v500_v53, %v3920_v52 }
  0xc5   :  { %513 = vst [vmem:[#allocation3 + $0x50] sm:$0x3] %v507_v54  ;;  %982 = vrot.lane.b32.xlu1 %v3625_v15, %s3517_s18  ;;  %980 = vrot.lane.b32.xlu0 %v3807_v50, %s3517_s18 }
  0xc7   :  { %v3928_v55 = vpop.permute.xlu1 %538  ;;  %v537_v56 = vpop.permute.xlu0 %536 }
  0xc8   :  { %v544_v57 = vsel %vm542_vm12, %v537_v56, %v3928_v55  ;;  %v1044_v7 = vld [vmem:[#allocation3 + $0x38] sm:$0xff] }
  0xc9   :  { %550 = vst [vmem:[#allocation3 + $0x50] sm:$0xc] %v544_v57  ;;  %1019 = vrot.lane.b32.xlu1 %v3771_v38, %s3518_s26  ;;  %1017 = vrot.lane.b32.xlu0 %v3625_v15, %s3518_s26 }
  0xcb   :  { %v3934_v58 = vpop.permute.xlu1 %575  ;;  %v574_v59 = vpop.permute.xlu0 %573 }
  0xcc   :  { %v581_v50 = vsel %vm579_vm13, %v574_v59, %v3934_v58 }
  0xcd   :  { %587 = vst [vmem:[#allocation3 + $0x50] sm:$0x30] %v581_v50  ;;  %978 = vrot.lane.b32.xlu1 %v3649_v23, %s3517_s18  ;;  %941 = vrot.lane.b32.xlu0 %v3625_v15, %s3516_s17  ;;  %v3520_v15 = vmov 0  }
  0xce   :  { %3480 = vset.pattern.permute.xlu0 %v3520_v15  ;;  %3481 = vset.pattern.permute.xlu1 %v3520_v15 }
  0xcf   :  { %v3942_v60 = vpop.permute.xlu1 %612  ;;  %v611_v38 = vpop.permute.xlu0 %610 }
  0xd0   :  { %v618_v61 = vsel %vm616_vm14, %v611_v38, %v3942_v60 }
  0xd1   :  { %624 = vst [vmem:[#allocation3 + $0x50] sm:$0xc0] %v618_v61  ;;  %947 = vrot.lane.b32.xlu1 %v3880_v24, %s3516_s17  ;;  %1015 = vrot.lane.b32.xlu0 %v3783_v42, %s3518_s26  ;;  %v1058_v42 = vld [vmem:[%s4440_s2] sm:$0xff]  ;;  %s3524_s17 = smov 33  }
  0xd3   :  { %v387_v23 = vpop.permute.xlu1 %386  ;;  %v350_v62 = vpop.permute.xlu0 %349 }
  0xd4   :  { %v395_v63 = vsel %vm394_vm8, %v387_v23, %v3884_v36  ;;  %v358_v1 = vsel %vm4454_vm7, %v350_v62, %v3869_v34 }
  0xd5   :  { %401 = vst [vmem:[#allocation3 + $0x30] sm:$0xc] %v395_v63  ;;  %364 = vst [vmem:[#allocation3 + $0x30] sm:$0x3] %v358_v1  ;;  %1021 = vrot.lane.b32.xlu1 %v3623_v14, %s3518_s26  ;;  %984 = vrot.lane.b32.xlu0 %v3795_v46, %s3517_s18  ;;  %s3526_s18 = smov 111  }
  0xd7   :  { %v461_v2 = vpop.permute.xlu1 %460  ;;  %v424_v3 = vpop.permute.xlu0 %423 }
  0xd8   :  { %v469_v4 = vsel %vm468_vm10, %v461_v2, %v463_v49  ;;  %v432_v6 = vsel %vm431_vm9, %v424_v3, %v3895_v44  ;;  %v1047_v8 = vld [vmem:[#allocation3 + $0x50] sm:$0xff] }
  0xd9   :  { %475 = vst [vmem:[#allocation3 + $0x30] sm:$0xc0] %v469_v4  ;;  %438 = vst [vmem:[#allocation3 + $0x30] sm:$0x30] %v432_v6  ;;  %v3384_v9 = vpack.c.bf16 %v1047_v8, %v1044_v7  ;;  %1061 = vperm.xlu0 %3480, %v1058_v42  }
  0xdb   :  { %v535_v14 = vpop.permute.xlu1 %534  ;;  %v498_v10 = vpop.permute.xlu0 %497  ;;  %3385 = vmatprep.subr.bf16.mxu0 %v3384_v9 }
  0xdc   :  { %v543_v46 = vsel %vm542_vm12, %v535_v14, %v537_v56  ;;  %v506_v11 = vsel %vm505_vm11, %v498_v10, %v500_v53 }
  0xdd   :  { %549 = vst [vmem:[#allocation3 + $0x48] sm:$0xc] %v543_v46  ;;  %512 = vst [vmem:[#allocation3 + $0x48] sm:$0x3] %v506_v11 }
  0xdf   :  { %v609_v13 = vpop.permute.xlu1 %608  ;;  %v572_v16 = vpop.permute.xlu0 %571 }
  0xe0   :  { %v617_v12 = vsel %vm616_vm14, %v609_v13, %v611_v38  ;;  %v580_v17 = vsel %vm579_vm13, %v572_v16, %v574_v59  ;;  %v1043_v30 = vld [vmem:[#allocation3 + $0x30] sm:$0xff] }
  0xe1   :  { %623 = vst [vmem:[#allocation3 + $0x48] sm:$0xc0] %v617_v12  ;;  %586 = vst [vmem:[#allocation3 + $0x48] sm:$0x30] %v580_v17 }
  0xe3   :  { %v393_v18 = vpop.permute.xlu1 %392  ;;  %v356_v19 = vpop.permute.xlu0 %355 }
  0xe4   :  { %v397_v20 = vsel %vm394_vm8, %v3882_v27, %v393_v18  ;;  %v360_v21 = vsel %vm4454_vm7, %v3867_v33, %v356_v19  ;;  %vm653_vm8 = vcmask 56320   ;;  %vm838_vm7 = vcmask 375808  }
  0xe5   :  { %403 = vst [vmem:[#allocation3 + $0x40] sm:$0xc] %v397_v20  ;;  %366 = vst [vmem:[#allocation3 + $0x40] sm:$0x3] %v360_v21 }
  0xe7   :  { %v467_v22 = vpop.permute.xlu1 %466  ;;  %v430_v25 = vpop.permute.xlu0 %429 }
  0xe8   :  { %v471_v26 = vsel %vm468_vm10, %v3912_v48, %v467_v22  ;;  %v434_v29 = vsel %vm431_vm9, %v3893_v43, %v430_v25  ;;  %v1046_v31 = vld [vmem:[#allocation3 + $0x48] sm:$0xff]  ;;  %vm690_vm9 = vcmask 48128   ;;  %vm727_vm10 = vcmask 457728  }
  0xe9   :  { %477 = vst [vmem:[#allocation3 + $0x40] sm:$0xc0] %v471_v26  ;;  %440 = vst [vmem:[#allocation3 + $0x40] sm:$0x30] %v434_v29  ;;  %v3386_v32 = vpack.c.bf16 %v1046_v31, %v1043_v30 }
  0xeb   :  { %v541_v34 = vpop.permute.xlu1 %540  ;;  %v504_v35 = vpop.permute.xlu0 %503  ;;  %3387 = vmatpush1.bf16.msra.mxu0 %v3386_v32 }
  0xec   :  { %v545_v33 = vsel %vm542_vm12, %v3928_v55, %v541_v34  ;;  %v508_v24 = vsel %vm505_vm11, %v3920_v52, %v504_v35  ;;  %vm764_vm11 = vcmask 449536  }
  0xed   :  { %551 = vst [vmem:[#allocation3 + $0x58] sm:$0xc] %v545_v33  ;;  %514 = vst [vmem:[#allocation3 + $0x58] sm:$0x3] %v508_v24 }
  0xef   :  { %v615_v27 = vpop.permute.xlu1 %614  ;;  %v578_v36 = vpop.permute.xlu0 %577 }
  0xf0   :  { %v619_v37 = vsel %vm616_vm14, %v3942_v60, %v615_v27  ;;  %v582_v39 = vsel %vm579_vm13, %v3934_v58, %v578_v36  ;;  %v1045_v49 = vld [vmem:[#allocation3 + $0x40] sm:$0xff]  ;;  %vm801_vm13 = vcmask 441344  }
  0xf1   :  { %625 = vst [vmem:[#allocation3 + $0x58] sm:$0xc0] %v619_v37  ;;  %588 = vst [vmem:[#allocation3 + $0x58] sm:$0x30] %v582_v39 }
  0xf3   :  { %v3984_v40 = vpop.permute.xlu1 %649  ;;  %v648_v41 = vpop.permute.xlu0 %647 }
  0xf4   :  { %v655_v43 = vsel %vm653_vm8, %v648_v41, %v3984_v40 }
  0xf5   :  { %661 = vst [vmem:[#allocation3 + $0x68] sm:$0x3] %v655_v43 }
  0xf7   :  { %v3988_v44 = vpop.permute.xlu1 %686  ;;  %v685_v45 = vpop.permute.xlu0 %684 }
  0xf8   :  { %v692_v48 = vsel %vm690_vm9, %v685_v45, %v3988_v44  ;;  %v1048_v51 = vld [vmem:[#allocation3 + $0x58] sm:$0xff] }
  0xf9   :  { %698 = vst [vmem:[#allocation3 + $0x68] sm:$0xc] %v692_v48  ;;  %v3396_v52 = vpack.c.bf16 %v1048_v51, %v1045_v49 }
  0xfb   :  { %v3992_v53 = vpop.permute.xlu1 %723  ;;  %v722_v54 = vpop.permute.xlu0 %721  ;;  %3397 = vmatpush3.bf16.msra.mxu1 %v3396_v52 }
  0xfc   :  { %v729_v55 = vsel %vm727_vm10, %v722_v54, %v3992_v53  ;;  %3398 = vmatprep.subr.bf16.mxu1 %v3498_v28 }
  0xfd   :  { %735 = vst [vmem:[#allocation3 + $0x68] sm:$0x30] %v729_v55 }
  0xff   :  { %v761_v56 = vpop.permute.xlu1 %760  ;;  %v759_v57 = vpop.permute.xlu0 %758 }
 0x100   :  { %v766_v58 = vsel %vm764_vm11, %v759_v57, %v761_v56 }
 0x101   :  { %772 = vst [vmem:[#allocation3 + $0x68] sm:$0xc0] %v766_v58 }
 0x103   :  { %v3998_v59 = vpop.permute.xlu1 %797  ;;  %v796_v50 = vpop.permute.xlu0 %795 }
 0x104   :  { %v803_v60 = vsel %vm801_vm13, %v796_v50, %v3998_v59 }
 0x105   :  { %809 = vst [vmem:[#allocation3 + $0x80] sm:$0x3] %v803_v60 }
 0x107   :  { %v835_v38 = vpop.permute.xlu1 %834  ;;  %v833_v61 = vpop.permute.xlu0 %832 }
 0x108   :  { %v840_v23 = vsel %vm838_vm7, %v833_v61, %v835_v38  ;;  %v1050_v46 = vld [vmem:[#allocation3 + $0x68] sm:$0xff] }
 0x109   :  { %846 = vst [vmem:[#allocation3 + $0x80] sm:$0xc] %v840_v23 }
 0x10b   :  { %v4003_v62 = vpop.permute.xlu1 %871  ;;  %v870_v15 = vpop.permute.xlu0 %869 }
 0x10c   :  { %v877_v63 = vsel %vm875_vm6, %v870_v15, %v4003_v62 }
 0x10d   :  { %883 = vst [vmem:[#allocation3 + $0x80] sm:$0x30] %v877_v63 }
 0x10f   :  { %v909_v1 = vpop.permute.xlu1 %908  ;;  %v907_v42 = vpop.permute.xlu0 %906 }
 0x110   :  { %v914_v2 = vsel %vm912_vm4, %v907_v42, %v909_v1 }
 0x111   :  { %920 = vst [vmem:[#allocation3 + $0x80] sm:$0xc0] %v914_v2 }
 0x113   :  { %v683_v3 = vpop.permute.xlu1 %682  ;;  %v646_v4 = vpop.permute.xlu0 %645 }
 0x114   :  { %v691_v6 = vsel %vm690_vm9, %v683_v3, %v685_v45  ;;  %v654_v7 = vsel %vm653_vm8, %v646_v4, %v648_v41 }
 0x115   :  { %697 = vst [vmem:[#allocation3 + $0x60] sm:$0xc] %v691_v6  ;;  %660 = vst [vmem:[#allocation3 + $0x60] sm:$0x3] %v654_v7  ;;  %v1036_v7 = vld [vmem:[%s4441_s1] sm:$0xff]  ;;  %s3527_s1 = smov 11  }
 0x117   :  { %v757_v8 = vpop.permute.xlu1 %756  ;;  %v720_v9 = vpop.permute.xlu0 %719 }
 0x118   :  { %v765_v14 = vsel %vm764_vm11, %v757_v8, %v759_v57  ;;  %v728_v10 = vsel %vm727_vm10, %v720_v9, %v722_v54  ;;  %v1053_v11 = vld [vmem:[#allocation3 + $0x80] sm:$0xff] }
 0x119   :  { %771 = vst [vmem:[#allocation3 + $0x60] sm:$0xc0] %v765_v14  ;;  %734 = vst [vmem:[#allocation3 + $0x60] sm:$0x30] %v728_v10  ;;  %v3388_v13 = vpack.c.bf16 %v1053_v11, %v1050_v46  ;;  %v4047_v10 = vsub.s32 0, %v3613_v5  ;;  %v4053_v11 = vsub.s32 1, %v3613_v5 }
 0x11a   :  { %v1210_v46 = vld [vmem:[%s4442_s5] sm:$0x7]  ;;  %s3528_s5 = smov 39  }
 0x11b   :  { %v831_v16 = vpop.permute.xlu1 %830  ;;  %v794_v12 = vpop.permute.xlu0 %793  ;;  %3389 = vmatprep.subr.bf16.mxu0 %v3388_v13 }
 0x11c   :  { %v839_v17 = vsel %vm838_vm7, %v831_v16, %v833_v61  ;;  %v802_v18 = vsel %vm801_vm13, %v794_v12, %v796_v50 }
 0x11d   :  { %845 = vst [vmem:[#allocation3 + $0x78] sm:$0xc] %v839_v17  ;;  %808 = vst [vmem:[#allocation3 + $0x78] sm:$0x3] %v802_v18  ;;  %v1214_v18 = vrot.slane %v1210_v46, %v4047_v10 }
 0x11f   :  { %v905_v19 = vpop.permute.xlu1 %904  ;;  %v868_v20 = vpop.permute.xlu0 %867 }
 0x120   :  { %v913_v21 = vsel %vm912_vm4, %v905_v19, %v907_v42  ;;  %v876_v22 = vsel %vm875_vm6, %v868_v20, %v870_v15  ;;  %v1049_v33 = vld [vmem:[#allocation3 + $0x60] sm:$0xff]  ;;  %v4061_v19 = vsub.s32 2, %v3613_v5 }
 0x121   :  { %919 = vst [vmem:[#allocation3 + $0x78] sm:$0xc0] %v913_v21  ;;  %882 = vst [vmem:[#allocation3 + $0x78] sm:$0x30] %v876_v22  ;;  %v1218_v21 = vrot.slane %v1210_v46, %v4053_v11 }
 0x123   :  { %v689_v25 = vpop.permute.xlu1 %688  ;;  %v652_v26 = vpop.permute.xlu0 %651 }
 0x124   :  { %v693_v29 = vsel %vm690_vm9, %v3988_v44, %v689_v25  ;;  %v656_v30 = vsel %vm653_vm8, %v3984_v40, %v652_v26  ;;  %vm949_vm8 = vcmask 293888   ;;  %vm1252_vm9 = vcmask 1043456  }
 0x125   :  { %699 = vst [vmem:[#allocation3 + $0x70] sm:$0xc] %v693_v29  ;;  %662 = vst [vmem:[#allocation3 + $0x70] sm:$0x3] %v656_v30 }
 0x127   :  { %v763_v31 = vpop.permute.xlu1 %762  ;;  %v726_v32 = vpop.permute.xlu0 %725 }
 0x128   :  { %v767_v34 = vsel %vm764_vm11, %v761_v56, %v763_v31  ;;  %v730_v35 = vsel %vm727_vm10, %v3992_v53, %v726_v32  ;;  %v1052_v24 = vld [vmem:[#allocation3 + $0x78] sm:$0xff]  ;;  %v1232_v32 = vld [vmem:[%s4443_s6] sm:$0x7]  ;;  %s3529_s6 = smov 67  }
 0x129   :  { %773 = vst [vmem:[#allocation3 + $0x70] sm:$0xc0] %v767_v34  ;;  %736 = vst [vmem:[#allocation3 + $0x70] sm:$0x30] %v730_v35  ;;  %v3390_v27 = vpack.c.bf16 %v1052_v24, %v1049_v33  ;;  %v1222_v35 = vrot.slane %v1210_v46, %v4061_v19 }
 0x12b   :  { %v837_v36 = vpop.permute.xlu1 %836  ;;  %v800_v37 = vpop.permute.xlu0 %799  ;;  %3391 = vmatpush1.bf16.msra.mxu0 %v3390_v27 }
 0x12c   :  { %v841_v39 = vsel %vm838_vm7, %v835_v38, %v837_v36  ;;  %v804_v40 = vsel %vm801_vm13, %v3998_v59, %v800_v37  ;;  %vm986_vm7 = vcmask 285696   ;;  %vm1224_vm13 = vcmp.eq.s32.totalorder %v1218_v21, %v3613_v5 }
 0x12d   :  { %847 = vst [vmem:[#allocation3 + $0x88] sm:$0xc] %v841_v39  ;;  %810 = vst [vmem:[#allocation3 + $0x88] sm:$0x3] %v804_v40  ;;  %v1237_v37 = vrot.slane %v1232_v32, %v4047_v10 }
 0x12f   :  { %v911_v41 = vpop.permute.xlu1 %910  ;;  %v874_v43 = vpop.permute.xlu0 %873 }
 0x130   :  { %v915_v44 = vsel %vm912_vm4, %v909_v1, %v911_v41  ;;  %v878_v45 = vsel %vm875_vm6, %v4003_v62, %v874_v43  ;;  %v1051_v55 = vld [vmem:[#allocation3 + $0x70] sm:$0xff]  ;;  %vm1023_vm4 = vcmask 277504   ;;  %v1241_v41 = vrot.slane %v1232_v32, %v4053_v11 }
 0x131   :  { %921 = vst [vmem:[#allocation3 + $0x88] sm:$0xc0] %v915_v44  ;;  %884 = vst [vmem:[#allocation3 + $0x88] sm:$0x30] %v878_v45  ;;  %v3301_v45 = vsel %vm1224_vm13, 1.0, %v3515_v47 }
 0x133   :  { %v946_v48 = vpop.permute.xlu1 %945  ;;  %v944_v49 = vpop.permute.xlu0 %943 }
 0x134   :  { %v951_v51 = vsel %vm949_vm8, %v944_v49, %v946_v48 }
 0x135   :  { %957 = vst [vmem:[#allocation3 + $0x98] sm:$0x3] %v951_v51 }
 0x137   :  { %v983_v52 = vpop.permute.xlu1 %982  ;;  %v981_v53 = vpop.permute.xlu0 %980 }
 0x138   :  { %v988_v54 = vsel %vm986_vm7, %v981_v53, %v983_v52  ;;  %v1054_v56 = vld [vmem:[#allocation3 + $0x88] sm:$0xff] }
 0x139   :  { %994 = vst [vmem:[#allocation3 + $0x98] sm:$0xc] %v988_v54  ;;  %v3399_v57 = vpack.c.bf16 %v1054_v56, %v1051_v55  ;;  %v4087_v56 = vmul.f32 %v3301_v45, %v1241_v41 }
 0x13b   :  { %v1020_v58 = vpop.permute.xlu1 %1019  ;;  %v1018_v59 = vpop.permute.xlu0 %1017  ;;  %3400 = vmatpush3.bf16.msra.mxu1 %v3399_v57 }
 0x13c   :  { %v1025_v50 = vsel %vm1023_vm4, %v1018_v59, %v1020_v58  ;;  %3362 = vmatprep.subr.mxu1 %v3515_v47 }
 0x13d   :  { %1031 = vst [vmem:[#allocation3 + $0x98] sm:$0x30] %v1025_v50 }
 0x13f   :  { %v979_v60 = vpop.permute.xlu1 %978  ;;  %v942_v38 = vpop.permute.xlu0 %941 }
 0x140   :  { %v987_v61 = vsel %vm986_vm7, %v979_v60, %v981_v53  ;;  %v950_v23 = vsel %vm949_vm8, %v942_v38, %v944_v49 }
 0x141   :  { %993 = vst [vmem:[#allocation3 + $0x90] sm:$0xc] %v987_v61  ;;  %956 = vst [vmem:[#allocation3 + $0x90] sm:$0x3] %v950_v23 }
 0x143   :  { %v948_v62 = vpop.permute.xlu1 %947  ;;  %v1016_v15 = vpop.permute.xlu0 %1015 }
 0x144   :  { %v952_v63 = vsel %vm949_vm8, %v946_v48, %v948_v62  ;;  %v1024_v1 = vsel %vm1023_vm4, %v1016_v15, %v1018_v59  ;;  %v1056_v42 = vld [vmem:[#allocation3 + $0x98] sm:$0xff]  ;;  %vm1225_vm8 = vcmp.eq.s32.totalorder %v1222_v35, %v3613_v5 }
 0x145   :  { %958 = vst [vmem:[#allocation3 + $0xa0] sm:$0x3] %v952_v63  ;;  %1030 = vst [vmem:[#allocation3 + $0x90] sm:$0x30] %v1024_v1  ;;  %1079 = vmatprep.subr.mxu0 %v1056_v42  ;;  %v3302_v55 = vsel %vm1225_vm8, 1.0, %v3515_v47  ;;  %vm2310_vm8 = vcmask 728064  }
 0x147   :  { %v1022_v2 = vpop.permute.xlu1 %1021  ;;  %v985_v3 = vpop.permute.xlu0 %984 }
 0x148   :  { %v1026_v4 = vsel %vm1023_vm4, %v1020_v58, %v1022_v2  ;;  %v989_v6 = vsel %vm986_vm7, %v983_v52, %v985_v3  ;;  %v1245_v52 = vrot.slane %v1232_v32, %v4061_v19 }
 0x149   :  { %1032 = vst [vmem:[#allocation3 + $0xa0] sm:$0x30] %v1026_v4  ;;  %995 = vst [vmem:[#allocation3 + $0xa0] sm:$0xc] %v989_v6 }
 0x14a   :  { %v4089_v60 = vmul.f32 %v3302_v55, %v1245_v52 }
 0x14c   :  { %v1055_v8 = vld [vmem:[#allocation3 + $0x90] sm:$0xff] }
 0x14d   :  { %1080 = vmatpush1.msra.mxu0 %v1055_v8 }
 0x14e   :  { %3298 = vmatmul.mubr.msk.f32.vlgmr.msra.gmra.mrb[0].mxu0 %vm727_vm10, %v1036_v7 }
 0x14f   :  { %1644 = vmatprep.mubr.f32.mxu0 %v3515_v47 }
 0x150   :  { %v1057_v9 = vld [vmem:[#allocation3 + $0xa0] sm:$0xff] }
 0x151   :  { %3363 = vmatpush3.msra.mxu1 %v1057_v9 }
 0x152   :  { %3365 = vmatmul.mubr.msk.f32.vlgmr.msra.gmra.mrb[0].mxu1 %vm727_vm10, %v1036_v7  ;;  %vm1223_vm10 = vcmp.eq.s32.totalorder %v1214_v18, %v3613_v5 }
 0x153   :  { %1715 = vmatprep.mubr.f32.mxu1 %v3515_v47  ;;  %v3300_v40 = vsel %vm1223_vm10, 1.0, %v3515_v47 }
 0x154   :  { %v4084_v53 = vmul.f32 %v3300_v40, %v1237_v37 }
 0x158   :  { %v1062_v14 = vpop.permute.xlu0 %1061 }
 0x221   :  { %v1133_v13 = vpop.f32.mrb[0].mxu0 }
 0x222   :  { %v4055_v16 = vadd.f32 %v1133_v13, %v1062_v14  ;;  %v1135_v12 = vpop.f32.mrb[1].mxu0 }
 0x223   :  { %v4057_v17 = vadd.f32 %v1135_v12, %v1062_v14 }
 0x224   :  { %v1253_v20 = vsel %vm1252_vm9, %v4055_v16, 0.0 }
 0x225   :  { %v1254_v22 = vrot.slane %v1253_v20, 4  ;;  %v1260_v25 = vsel %vm1252_vm9, %v4057_v17, 0.0  ;;  %v1204_v26 = vpop.f32.mrb[0].mxu1 }
 0x226   :  { %v1261_v29 = vrot.slane %v1260_v25, 4  ;;  %v4068_v30 = vadd.f32 %v1204_v26, %v1062_v14  ;;  %v3366_v31 = vpop.f32.mrb[1].mxu1 }
 0x227   :  { %v1255_v34 = vadd.f32 %v1254_v22, %v1253_v20 }
 0x228   :  { %v1262_v33 = vadd.f32 %v1261_v29, %v1260_v25  ;;  %v1267_v24 = vsel %vm1252_vm9, %v4068_v30, 0.0 }
 0x229   :  { %v1256_v27 = vrot.slane %v1255_v34, 2  ;;  %v1268_v36 = vrot.slane %v1267_v24, 4 }
 0x22a   :  { %v1263_v39 = vrot.slane %v1262_v33, 2 }
 0x22b   :  { %v1257_v43 = vadd.f32 %v1256_v27, %v1255_v34  ;;  %v1269_v44 = vadd.f32 %v1268_v36, %v1267_v24 }
 0x22c   :  { %v1264_v48 = vadd.f32 %v1263_v39, %v1262_v33 }
 0x22d   :  { %v1258_v49 = vrot.slane %v1257_v43, 1  ;;  %v1270_v51 = vrot.slane %v1269_v44, 2 }
 0x22e   :  { %v1265_v54 = vrot.slane %v1264_v48, 1 }
 0x22f   :  { %v1259_v57 = vadd.f32 %v1258_v49, %v1257_v43  ;;  %v1271_v58 = vadd.f32 %v1270_v51, %v1269_v44 }
 0x230   :  { %v1266_v59 = vadd.f32 %v1265_v54, %v1264_v48 }
 0x231   :  { %v1272_v50 = vrot.slane %v1271_v58, 1  ;;  %v1274_v38 = vmul.f32 %v1259_v57, %v4084_v53 }
 0x232   :  { %v1275_v61 = vmul.f32 %v1266_v59, %v4087_v56 }
 0x233   :  { %v1273_v23 = vadd.f32 %v1272_v50, %v1271_v58  ;;  %v1277_v62 = vsel %vm1252_vm9, %v1274_v38, 0.0 }
 0x234   :  { %v1278_v15 = vsel %vm1252_vm9, %v1275_v61, 0.0 }
 0x235   :  { %v1276_v63 = vmul.f32 %v1273_v23, %v4089_v60  ;;  %v1279_v1 = vadd.f32 %v1278_v15, %v1277_v62 }
 0x237   :  { %v1280_v42 = vsel %vm1252_vm9, %v1276_v63, 0.0 }
 0x238   :  { %v1281_v2 = vadd.f32 %v1280_v42, %v1279_v1 }
 0x23a   :  { %1282 = vadd.xlane.f32.xlu1 %v1281_v2 }
 0x2c7   :  { %v1283_v3 = vpop.xlane.xlu1 %1282 }
 0x2c8   :  { %v4097_v4 = vmul.f32 0.00390625, %v1283_v3 }
 0x2ca   :  { %v1286_v6 = vmul.f32 %v4097_v4, %v4084_v53  ;;  %v1287_v7 = vmul.f32 %v4097_v4, %v4087_v56  ;;  %v1288_v8 = vmul.f32 %v4097_v4, %v4089_v60 }
 0x2cc   :  { %v1289_v9 = vsel %vm1252_vm9, %v1286_v6, 0.0  ;;  %v1296_v14 = vsel %vm1252_vm9, %v1287_v7, 0.0  ;;  %v1303_v46 = vsel %vm1252_vm9, %v1288_v8, 0.0 }
 0x2cd   :  { %v1290_v13 = vrot.slane %v1289_v9, 4  ;;  %v1297_v12 = vrot.slane %v1296_v14, 4  ;;  %v1304_v18 = vrot.slane %v1303_v46, 4 }
 0x2cf   :  { %v1291_v20 = vadd.f32 %v1290_v13, %v1289_v9  ;;  %v1298_v21 = vadd.f32 %v1297_v12, %v1296_v14  ;;  %v1305_v22 = vadd.f32 %v1304_v18, %v1303_v46 }
 0x2d1   :  { %v1292_v25 = vrot.slane %v1291_v20, 2  ;;  %v1299_v26 = vrot.slane %v1298_v21, 2  ;;  %v1306_v29 = vrot.slane %v1305_v22, 2 }
 0x2d3   :  { %v1293_v31 = vadd.f32 %v1292_v25, %v1291_v20  ;;  %v1300_v32 = vadd.f32 %v1299_v26, %v1298_v21  ;;  %v1307_v34 = vadd.f32 %v1306_v29, %v1305_v22  ;;  %v1432_v25 = vld [vmem:[%s4444_s11] sm:$0xf] }
 0x2d4   :  { %v1436_v26 = vrot.slane %v1432_v25, %v4047_v10  ;;  %v1461_v29 = vld [vmem:[%s4445_s12] sm:$0xf] }
 0x2d5   :  { %v1294_v35 = vrot.slane %v1293_v31, 1  ;;  %v1301_v33 = vrot.slane %v1300_v32, 1  ;;  %v1308_v24 = vrot.slane %v1307_v34, 1 }
 0x2d6   :  { %vm1449_vm7 = vcmp.eq.s32.totalorder %v1436_v26, %v3613_v5 }
 0x2d7   :  { %v1295_v27 = vadd.f32 %v1294_v35, %v1293_v31  ;;  %v1302_v36 = vadd.f32 %v1301_v33, %v1300_v32  ;;  %v1309_v37 = vadd.f32 %v1308_v24, %v1307_v34  ;;  %v1440_v31 = vrot.slane %v1432_v25, %v4053_v11  ;;  %v1350_v35 = vld [vmem:[%s4446_s3] sm:$0xf]  ;;  %s3521_s3 = smov 73  }
 0x2d8   :  { %v1444_v32 = vrot.slane %v1432_v25, %v4061_v19  ;;  %v1447_v34 = vsub.s32 3, %v3613_v5  ;;  %v1466_v33 = vrot.slane %v1461_v29, %v4047_v10 }
 0x2d9   :  { %v1310_v39 = vsub.f32 %v4055_v16, %v1295_v27  ;;  %v1311_v40 = vsub.f32 %v4057_v17, %v1302_v36  ;;  %v1312_v41 = vsub.f32 %v4068_v30, %v1309_v37  ;;  %v3303_v27 = vsel %vm1449_vm7, 1.0, %v3515_v47 }
 0x2da   :  { %vm1450_vm4 = vcmp.eq.s32.totalorder %v1440_v31, %v3613_v5  ;;  %vm1451_vm10 = vcmp.eq.s32.totalorder %v1444_v32, %v3613_v5  ;;  %v1448_v37 = vrot.slane %v1432_v25, %v1447_v34 }
 0x2db   :  { %v1313_v43 = vmul.f32 %v1310_v39, %v1310_v39  ;;  %v1314_v44 = vmul.f32 %v1311_v40, %v1311_v40  ;;  %v1315_v45 = vmul.f32 %v1312_v41, %v1312_v41  ;;  %v1352_v39 = vld [vmem:[%s4447_s4] sm:$0xf]  ;;  %v1483_v41 = vmul.f32 %v3303_v27, %v1466_v33  ;;  %s3522_s4 = smov 89  }
 0x2dc   :  { %vm1452_vm13 = vcmp.eq.s32.totalorder %v1448_v37, %v3613_v5 }
 0x2dd   :  { %v1316_v48 = vsel %vm1252_vm9, %v1313_v43, 0.0  ;;  %v1323_v49 = vsel %vm1252_vm9, %v1314_v44, 0.0  ;;  %v1330_v51 = vsel %vm1252_vm9, %v1315_v45, 0.0  ;;  %v1470_v43 = vrot.slane %v1461_v29, %v4053_v11 }
 0x2de   :  { %v1317_v52 = vrot.slane %v1316_v48, 4  ;;  %v1324_v54 = vrot.slane %v1323_v49, 4  ;;  %v1331_v55 = vrot.slane %v1330_v51, 4  ;;  %v1474_v44 = vrot.slane %v1461_v29, %v4061_v19 }
 0x2df   :  { %v3304_v45 = vsel %vm1450_vm4, 1.0, %v3515_v47 }
 0x2e0   :  { %v1318_v57 = vadd.f32 %v1317_v52, %v1316_v48  ;;  %v1325_v58 = vadd.f32 %v1324_v54, %v1323_v49  ;;  %v1332_v59 = vadd.f32 %v1331_v55, %v1330_v51  ;;  %v3305_v48 = vsel %vm1451_vm10, 1.0, %v3515_v47 }
 0x2e1   :  { %v1484_v51 = vmul.f32 %v3304_v45, %v1470_v43  ;;  %v1485_v52 = vmul.f32 %v3305_v48, %v1474_v44  ;;  %v1478_v54 = vrot.slane %v1461_v29, %v1447_v34 }
 0x2e2   :  { %v1319_v50 = vrot.slane %v1318_v57, 2  ;;  %v1326_v38 = vrot.slane %v1325_v58, 2  ;;  %v1333_v61 = vrot.slane %v1332_v59, 2 }
 0x2e4   :  { %v1320_v23 = vadd.f32 %v1319_v50, %v1318_v57  ;;  %v1327_v62 = vadd.f32 %v1326_v38, %v1325_v58  ;;  %v1334_v15 = vadd.f32 %v1333_v61, %v1332_v59 }
 0x2e6   :  { %v1321_v63 = vrot.slane %v1320_v23, 1  ;;  %v1328_v1 = vrot.slane %v1327_v62, 1  ;;  %v1335_v42 = vrot.slane %v1334_v15, 1 }
 0x2e8   :  { %v1322_v2 = vadd.f32 %v1321_v63, %v1320_v23  ;;  %v1329_v3 = vadd.f32 %v1328_v1, %v1327_v62  ;;  %v1336_v6 = vadd.f32 %v1335_v42, %v1334_v15 }
 0x2ea   :  { %v1337_v7 = vmul.f32 %v1322_v2, %v4084_v53  ;;  %v1338_v8 = vmul.f32 %v1329_v3, %v4087_v56  ;;  %v1339_v9 = vmul.f32 %v1336_v6, %v4089_v60 }
 0x2ec   :  { %v1340_v14 = vsel %vm1252_vm9, %v1337_v7, 0.0  ;;  %v1341_v46 = vsel %vm1252_vm9, %v1338_v8, 0.0  ;;  %v1343_v12 = vsel %vm1252_vm9, %v1339_v9, 0.0 }
 0x2ed   :  { %v1342_v13 = vadd.f32 %v1341_v46, %v1340_v14 }
 0x2ef   :  { %v1344_v18 = vadd.f32 %v1343_v12, %v1342_v13 }
 0x2f1   :  { %1345 = vadd.xlane.f32.xlu0 %v1344_v18 }
 0x37e   :  { %v1346_v20 = vpop.xlane.xlu0 %1345 }
 0x37f   :  { %v1347_v21 = vmul.f32 0.00390625, %v1346_v20 }
 0x381   :  { %v1348_v22 = vadd.f32 1e-05, %v1347_v21 }
 0x383   :  { %3486 = vrsqrt.f32 %v1348_v22 }
 0x38d   :  { %v3487_v24 = vpop.eup %3486 }
 0x38e   :  { %v1351_v36 = vmul.f32 %v3487_v24, %v1350_v35 }
 0x390   :  { %1357 = vperm.xlu1 %3481, %v1351_v36   ;;  %v1353_v40 = vmul.f32 %v1351_v36, %v4097_v4  ;;  %v3306_v4 = vsel %vm1452_vm13, 1.0, %v3515_v47  ;;  %vm1568_vm13 = vcmask 678912  }
 0x391   :  { %v1486_v55 = vmul.f32 %v3306_v4, %v1478_v54 }
 0x392   :  { %v1354_v49 = vsub.f32 %v1352_v39, %v1353_v40 }
 0x394   :  { %1386 = vperm.xlu0 %3480, %v1354_v49   ;;  %1532 = vrot.lane.b32.xlu1 %v1483_v41, %s3513_s15 }
 0x398   :  { %1534 = vrot.lane.b32.xlu1 %v1484_v51, %s3513_s15  ;;  %1536 = vrot.lane.b32.xlu0 %v1485_v52, %s3513_s15 }
 0x39c   :  { %1538 = vrot.lane.b32.xlu1 %v1486_v55, %s3513_s15  ;;  %1504 = vrot.lane.b32.xlu0 %v1483_v41, %s3521_s3  ;;  %s3523_s15 = smov 61  }
 0x3a0   :  { %1506 = vrot.lane.b32.xlu1 %v1484_v51, %s3521_s3  ;;  %1508 = vrot.lane.b32.xlu0 %v1485_v52, %s3521_s3 }
 0x3a4   :  { %1510 = vrot.lane.b32.xlu1 %v1486_v55, %s3521_s3  ;;  %1900 = vrot.lane.b32.xlu0 %v1483_v41, %s3504_s30 }
 0x3a8   :  { %1902 = vrot.lane.b32.xlu1 %v1484_v51, %s3504_s30  ;;  %1904 = vrot.lane.b32.xlu0 %v1485_v52, %s3504_s30 }
 0x3ac   :  { %1906 = vrot.lane.b32.xlu1 %v1486_v55, %s3504_s30  ;;  %2098 = vrot.lane.b32.xlu0 %v1483_v41, %s3494_s21  ;;  %s3525_s30 = smov 83  }
 0x3b0   :  { %2100 = vrot.lane.b32.xlu1 %v1484_v51, %s3494_s21  ;;  %2102 = vrot.lane.b32.xlu0 %v1485_v52, %s3494_s21 }
 0x3b4   :  { %2104 = vrot.lane.b32.xlu1 %v1486_v55, %s3494_s21  ;;  %2302 = vrot.lane.b32.xlu0 %v1483_v41, %s3522_s4 }
 0x3b8   :  { %2304 = vrot.lane.b32.xlu1 %v1484_v51, %s3522_s4  ;;  %2306 = vrot.lane.b32.xlu0 %v1485_v52, %s3522_s4 }
 0x3bc   :  { %2308 = vrot.lane.b32.xlu1 %v1486_v55, %s3522_s4  ;;  %2507 = vrot.lane.b32.xlu0 %v1483_v41, %s3523_s15 }
 0x3c0   :  { %2509 = vrot.lane.b32.xlu1 %v1484_v51, %s3523_s15  ;;  %2511 = vrot.lane.b32.xlu0 %v1485_v52, %s3523_s15 }
 0x3c4   :  { %2513 = vrot.lane.b32.xlu1 %v1486_v55, %s3523_s15  ;;  %2712 = vrot.lane.b32.xlu0 %v1483_v41, %s3524_s17 }
 0x3c8   :  { %2714 = vrot.lane.b32.xlu1 %v1484_v51, %s3524_s17  ;;  %2716 = vrot.lane.b32.xlu0 %v1485_v52, %s3524_s17 }
 0x3cc   :  { %2718 = vrot.lane.b32.xlu1 %v1486_v55, %s3524_s17 }
 0x40f   :  { %v1358_v57 = vpop.permute.xlu1 %1357 }
 0x410   :  { %v1360_v58 = vmul.f32 %v1358_v57, %v4084_v53  ;;  %v1361_v59 = vmul.f32 %v1358_v57, %v4087_v56  ;;  %v1362_v50 = vmul.f32 %v1358_v57, %v4089_v60 }
 0x412   :  { %v1363_v38 = vsel %vm1252_vm9, %v1360_v58, 0.0  ;;  %v1370_v61 = vsel %vm1252_vm9, %v1361_v59, 0.0  ;;  %v1377_v23 = vsel %vm1252_vm9, %v1362_v50, 0.0 }
 0x413   :  { %v1364_v62 = vrot.slane %v1363_v38, 4  ;;  %v1371_v15 = vrot.slane %v1370_v61, 4  ;;  %v1378_v63 = vrot.slane %v1377_v23, 4  ;;  %v1533_v1 = vpop.permute.xlu1 %1532  ;;  %v1387_v42 = vpop.permute.xlu0 %1386 }
 0x414   :  { %v1389_v2 = vmul.f32 %v1387_v42, %v4084_v53  ;;  %v1390_v3 = vmul.f32 %v1387_v42, %v4087_v56  ;;  %v1391_v6 = vmul.f32 %v1387_v42, %v4089_v60  ;;  %v1548_v44 = vmul.f32 0.0, %v1533_v1 }
 0x415   :  { %v1365_v7 = vadd.f32 %v1364_v62, %v1363_v38  ;;  %v1372_v8 = vadd.f32 %v1371_v15, %v1370_v61  ;;  %v1379_v9 = vadd.f32 %v1378_v63, %v1377_v23 }
 0x416   :  { %v1392_v14 = vsel %vm1252_vm9, %v1389_v2, 0.0  ;;  %v1399_v46 = vsel %vm1252_vm9, %v1390_v3, 0.0  ;;  %v1406_v13 = vsel %vm1252_vm9, %v1391_v6, 0.0  ;;  %vm1512_vm9 = vcmask 596992  }
 0x417   :  { %v1366_v12 = vrot.slane %v1365_v7, 2  ;;  %v1380_v18 = vrot.slane %v1379_v9, 2  ;;  %v1393_v20 = vrot.slane %v1392_v14, 4  ;;  %v4172_v21 = vpop.permute.xlu1 %1534  ;;  %v4174_v22 = vpop.permute.xlu0 %1536  ;;  %v1400_v53 = vrot.slane %v1399_v46, 4 }
 0x418   :  { %v1407_v56 = vrot.slane %v1406_v13, 4  ;;  %v1540_v60 = vsel %vm875_vm6, %v1533_v1, %v4172_v21  ;;  %v1373_v26 = vrot.slane %v1372_v8, 2 }
 0x419   :  { %v1367_v25 = vadd.f32 %v1366_v12, %v1365_v7  ;;  %v1394_v29 = vadd.f32 %v1393_v20, %v1392_v14  ;;  %v1381_v31 = vadd.f32 %v1380_v18, %v1379_v9  ;;  %v1401_v32 = vadd.f32 %v1400_v53, %v1399_v46 }
 0x41a   :  { %v1408_v34 = vadd.f32 %v1407_v56, %v1406_v13  ;;  %v1549_v35 = vmul.f32 0.0, %v1540_v60  ;;  %v1374_v39 = vadd.f32 %v1373_v26, %v1372_v8  ;;  %v1541_v60 = vsel %vm875_vm6, %v4172_v21, %v4174_v22 }
 0x41b   :  { %v1395_v33 = vrot.slane %v1394_v29, 2  ;;  %v4178_v24 = vpop.permute.xlu1 %1538  ;;  %v1505_v27 = vpop.permute.xlu0 %1504  ;;  %v1402_v36 = vrot.slane %v1401_v32, 2  ;;  %v1368_v41 = vrot.slane %v1367_v25, 1  ;;  %v1382_v43 = vrot.slane %v1381_v31, 1 }
 0x41c   :  { %v1409_v37 = vrot.slane %v1408_v34, 2  ;;  %1560 = vrot.lane.b32.xlu0 %v1549_v35, %s3525_s30  ;;  %v1375_v57 = vrot.slane %v1374_v39, 1  ;;  %v1521_v2 = vmul.f32 0.0, %v1505_v27 }
 0x41d   :  { %v1396_v40 = vadd.f32 %v1395_v33, %v1394_v29  ;;  %v1403_v48 = vadd.f32 %v1402_v36, %v1401_v32  ;;  %v1369_v50 = vadd.f32 %v1368_v41, %v1367_v25  ;;  %v1383_v38 = vadd.f32 %v1382_v43, %v1381_v31 }
 0x41e   :  { %v1410_v45 = vadd.f32 %v1409_v37, %v1408_v34  ;;  %v1376_v42 = vadd.f32 %v1375_v57, %v1374_v39  ;;  %v1542_v32 = vsel %vm875_vm6, %v4174_v22, %v4178_v24  ;;  %vm2515_vm6 = vcmask 498688  }
 0x41f   :  { %v1507_v49 = vpop.permute.xlu1 %1506  ;;  %v1509_v51 = vpop.permute.xlu0 %1508  ;;  %v1397_v52 = vrot.slane %v1396_v40, 1  ;;  %v1404_v61 = vrot.slane %v1403_v48, 1  ;;  %v1413_v3 = vmul.f32 %v1369_v50, %v4055_v16  ;;  %v1415_v6 = vmul.f32 %v1383_v38, %v4068_v30 }
 0x420   :  { %v1411_v54 = vrot.slane %v1410_v45, 1  ;;  %v1513_v4 = vsel %vm1512_vm9, %v1505_v27, %v1507_v49  ;;  %1558 = vrot.lane.b32.xlu0 %v1548_v44, %s3525_s30  ;;  %v1514_v55 = vsel %vm1512_vm9, %v1507_v49, %v1509_v51  ;;  %v1414_v13 = vmul.f32 %v1376_v42, %v4057_v17 }
 0x421   :  { %v1522_v58 = vmul.f32 0.0, %v1513_v4  ;;  %v1523_v59 = vmul.f32 0.0, %v1514_v55  ;;  %v1398_v15 = vadd.f32 %v1397_v52, %v1396_v40  ;;  %v1405_v7 = vadd.f32 %v1404_v61, %v1403_v48 }
 0x422   :  { %v1412_v63 = vadd.f32 %v1411_v54, %v1410_v45 }
 0x423   :  { %v1511_v23 = vpop.permute.xlu1 %1510  ;;  %1729 = vrot.lane.b32.xlu1 %v1522_v58, %s3510_s27  ;;  %v1901_v62 = vpop.permute.xlu0 %1900  ;;  %v1416_v14 = vadd.f32 %v1413_v3, %v1398_v15  ;;  %v1417_v12 = vadd.f32 %v1414_v13, %v1405_v7 }
 0x424   :  { %1731 = vrot.lane.b32.xlu0 %v1523_v59, %s3510_s27  ;;  %v1916_v1 = vmul.f32 0.0, %v1901_v62  ;;  %v1418_v46 = vadd.f32 %v1415_v6, %v1412_v63  ;;  %v1515_v34 = vsel %vm1512_vm9, %v1509_v51, %v1511_v23 }
 0x425   :  { %v4193_v16 = vmax.f32 %v1416_v14, 0.0  ;;  %v4200_v26 = vmax.f32 %v1417_v12, 0.0 }
 0x426   :  { %v4191_v53 = vmax.f32 %v1418_v46, 0.0 }
 0x427   :  { %v1903_v8 = vpop.permute.xlu1 %1902  ;;  %1727 = vrot.lane.b32.xlu1 %v1521_v2, %s3510_s27  ;;  %v1905_v9 = vpop.permute.xlu0 %1904  ;;  %v1550_v29 = vmul.f32 %v1541_v60, %v4193_v16  ;;  %v1551_v33 = vmul.f32 %v1542_v32, %v4200_v26  ;;  %v1524_v27 = vmul.f32 %v1515_v34, %v4193_v16  ;;  %v1525_v43 = vmul.f32 %v1511_v23, %v4200_v26 }
 0x428   :  { %1926 = vrot.lane.b32.xlu0 %v1916_v1, %s3526_s18  ;;  %v1552_v31 = vmul.f32 %v4178_v24, %v4191_v53  ;;  %v1908_v36 = vsel %vm542_vm12, %v1901_v62, %v1903_v8  ;;  %v1909_v45 = vsel %vm542_vm12, %v1903_v8, %v1905_v9 }
 0x429   :  { %v1917_v41 = vmul.f32 %v1908_v36, %v4193_v16  ;;  %v1918_v51 = vmul.f32 %v1909_v45, %v4200_v26 }
 0x42b   :  { %v1907_v18 = vpop.permute.xlu1 %1906  ;;  %v2099_v20 = vpop.permute.xlu0 %2098 }
 0x42c   :  { %v1920_v30 = vmul.f32 0.0, %v1907_v18  ;;  %v2114_v56 = vmul.f32 0.0, %v2099_v20  ;;  %v1910_v54 = vsel %vm542_vm12, %v1905_v9, %v1907_v18  ;;  %vm2720_vm12 = vcmask 269312  }
 0x42d   :  { %v1919_v57 = vmul.f32 %v1910_v54, %v4191_v53 }
 0x42e   :  { %1934 = vrot.lane.b32.xlu0 %v1920_v30, %s3526_s18  ;;  %2124 = vrot.lane.b32.xlu1 %v2114_v56, %s3527_s1 }
 0x42f   :  { %v2101_v25 = vpop.permute.xlu1 %2100  ;;  %v2103_v17 = vpop.permute.xlu0 %2102 }
 0x430   :  { %v2107_v55 = vsel %vm209_vm3, %v2101_v25, %v2103_v17  ;;  %v2106_v58 = vsel %vm209_vm3, %v2099_v20, %v2101_v25 }
 0x431   :  { %v2116_v59 = vmul.f32 %v2107_v55, %v4200_v26  ;;  %v2115_v38 = vmul.f32 %v2106_v58, %v4193_v16 }
 0x432   :  { %1566 = vrot.lane.b32.xlu0 %v1552_v31, %s3525_s30  ;;  %1562 = vrot.lane.b32.xlu1 %v1550_v29, %s3525_s30 }
 0x433   :  { %v2105_v21 = vpop.permute.xlu1 %2104  ;;  %v2303_v35 = vpop.permute.xlu0 %2302 }
 0x434   :  { %v2118_v37 = vmul.f32 0.0, %v2105_v21  ;;  %v2108_v50 = vsel %vm209_vm3, %v2103_v17, %v2105_v21  ;;  %v2319_v3 = vmul.f32 %v2303_v35, %v4193_v16 }
 0x435   :  { %v2117_v61 = vmul.f32 %v2108_v50, %v4191_v53 }
 0x436   :  { %1733 = vrot.lane.b32.xlu0 %v1524_v27, %s3510_s27  ;;  %1564 = vrot.lane.b32.xlu1 %v1551_v33, %s3525_s30 }
 0x437   :  { %v2305_v39 = vpop.permute.xlu1 %2304  ;;  %v2307_v40 = vpop.permute.xlu0 %2306 }
 0x438   :  { %v2311_v62 = vsel %vm2310_vm8, %v2303_v35, %v2305_v39  ;;  %v2312_v1 = vsel %vm2310_vm8, %v2305_v39, %v2307_v40  ;;  %v3309_v35 = vadd.s32 2, %v3613_v5  ;;  %v3307_v39 = vadd.s32 3, %v3613_v5 }
 0x439   :  { %v2320_v63 = vmul.f32 %v2311_v62, %v4200_v26  ;;  %v2321_v2 = vmul.f32 %v2312_v1, %v4191_v53 }
 0x43a   :  { %1928 = vrot.lane.b32.xlu0 %v1917_v41, %s3526_s18  ;;  %2132 = vrot.lane.b32.xlu1 %v2118_v37, %s3527_s1 }
 0x43b   :  { %v2309_v22 = vpop.permute.xlu1 %2308  ;;  %v2508_v24 = vpop.permute.xlu0 %2507 }
 0x43c   :  { %v2323_v44 = vmul.f32 0.0, %v2309_v22  ;;  %v2313_v23 = vsel %vm2310_vm8, %v2307_v40, %v2309_v22  ;;  %v2524_v16 = vmul.f32 %v2508_v24, %v4200_v26 }
 0x43d   :  { %v2322_v15 = vmul.f32 0.0, %v2313_v23 }
 0x43e   :  { %1735 = vrot.lane.b32.xlu1 %v1525_v43, %s3510_s27  ;;  %2337 = vrot.lane.b32.xlu0 %v2323_v44, %s3528_s5  ;;  %s3530_s27 = smov 95  }
 0x43f   :  { %v2510_v48 = vpop.permute.xlu1 %2509  ;;  %v2512_v49 = vpop.permute.xlu0 %2511 }
 0x440   :  { %v2517_v52 = vsel %vm2515_vm6, %v2510_v48, %v2512_v49  ;;  %v2516_v46 = vsel %vm2515_vm6, %v2508_v24, %v2510_v48 }
 0x441   :  { %v2526_v4 = vmul.f32 0.0, %v2517_v52  ;;  %v2525_v18 = vmul.f32 %v2516_v46, %v4191_v53  ;;  %v3315_v52 = vadd.s32 1, %v3613_v5 }
 0x442   :  { %1930 = vrot.lane.b32.xlu1 %v1918_v51, %s3526_s18 }
 0x443   :  { %2538 = vrot.lane.b32.xlu0 %v2526_v4, %s3529_s6  ;;  %v2514_v42 = vpop.permute.xlu1 %2513  ;;  %v2713_v9 = vpop.permute.xlu0 %2712 }
 0x444   :  { %v2518_v7 = vsel %vm2515_vm6, %v2512_v49, %v2514_v42  ;;  %v2528_v8 = vmul.f32 0.0, %v2514_v42  ;;  %v2729_v30 = vmul.f32 %v2713_v9, %v4191_v53  ;;  %v4259_v53 = vand.u32 127, %v53_v0 }
 0x445   :  { %v2527_v13 = vmul.f32 0.0, %v2518_v7 }
 0x446   :  { %1932 = vrot.lane.b32.xlu1 %v1919_v57, %s3526_s18  ;;  %vm1496_vm7 = vcmp.lt.s32.totalorder %v4259_v53, 4  ;;  %vm1528_vm4 = vcmp.eq.s32.totalorder %v4259_v53, %v3309_v35  ;;  %vm1495_vm9 = vcmp.eq.s32.totalorder %v4259_v53, %v3307_v39  ;;  %vm1896_vm8 = vcmp.eq.s32.totalorder %v4259_v53, %v3315_v52 }
 0x447   :  { %2128 = vrot.lane.b32.xlu0 %v2116_v59, %s3527_s1  ;;  %v2715_v6 = vpop.permute.xlu1 %2714  ;;  %v2717_v20 = vpop.permute.xlu0 %2716  ;;  %vm1529_vm10 = vmand %vm1528_vm4, %vm1496_vm7  ;;  %vm1936_vm4 = vcmask 908288  }
 0x448   :  { %v2721_v14 = vsel %vm2720_vm12, %v2713_v9, %v2715_v6  ;;  %v2722_v56 = vsel %vm2720_vm12, %v2715_v6, %v2717_v20  ;;  %v3310_v22 = vsel %vm1529_vm10, 1.0, %v3515_v47  ;;  %vm1497_vm6 = vmand %vm1495_vm9, %vm1496_vm7  ;;  %vm2134_vm10 = vcmask 89088  }
 0x449   :  { %v2730_v12 = vmul.f32 0.0, %v2721_v14  ;;  %v2731_v17 = vmul.f32 0.0, %v2722_v56  ;;  %v3308_v55 = vsel %vm1497_vm6, 1.0, %v3515_v47  ;;  %vm2339_vm9 = vcmask 318464  }
 0x44a   :  { %2126 = vrot.lane.b32.xlu1 %v2115_v38, %s3527_s1 }
 0x44b   :  { %2130 = vrot.lane.b32.xlu0 %v2117_v61, %s3527_s1  ;;  %v2719_v60 = vpop.permute.xlu1 %2718 }
 0x44c   :  { %v2733_v25 = vmul.f32 0.0, %v2719_v60  ;;  %v2723_v29 = vsel %vm2720_vm12, %v2717_v20, %v2719_v60  ;;  %vm1897_vm12 = vmand %vm1896_vm8, %vm1496_vm7 }
 0x44d   :  { %v2732_v31 = vmul.f32 0.0, %v2723_v29  ;;  %v3316_v62 = vsel %vm1897_vm12, 1.0, %v3515_v47  ;;  %v3326_v29 = vadd.s32 4294967294, %v3613_v5  ;;  %vm2544_vm12 = vcmask 547840  }
 0x44e   :  { %2335 = vrot.lane.b32.xlu1 %v2322_v15, %s3528_s5 }
 0x44f   :  { %2331 = vrot.lane.b32.xlu0 %v2320_v63, %s3528_s5 }
 0x452   :  { %2333 = vrot.lane.b32.xlu1 %v2321_v2, %s3528_s5 }
 0x453   :  { %2329 = vrot.lane.b32.xlu0 %v2319_v3, %s3528_s5  ;;  %v3322_v3 = vadd.s32 4294967295, %v3613_v5 }
 0x455   :  { %vm2298_vm6 = vcmp.eq.s32.totalorder %v4259_v53, %v3322_v3 }
 0x456   :  { %2542 = vrot.lane.b32.xlu1 %v2528_v8, %s3529_s6  ;;  %vm2299_vm8 = vmand %vm2298_vm6, %vm1496_vm7 }
 0x457   :  { %2540 = vrot.lane.b32.xlu0 %v2527_v13, %s3529_s6 }
 0x45a   :  { %2536 = vrot.lane.b32.xlu1 %v2525_v18, %s3529_s6 }
 0x45b   :  { %2741 = vrot.lane.b32.xlu0 %v2730_v12, %s3530_s27 }
 0x45e   :  { %2534 = vrot.lane.b32.xlu1 %v2524_v16, %s3529_s6 }
 0x45f   :  { %2739 = vrot.lane.b32.xlu0 %v2729_v30, %s3530_s27 }
 0x462   :  { %2743 = vrot.lane.b32.xlu1 %v2731_v17, %s3530_s27 }
 0x463   :  { %2747 = vrot.lane.b32.xlu0 %v2733_v25, %s3530_s27  ;;  %v3323_v25 = vsel %vm2299_vm8, 1.0, %v3515_v47  ;;  %vm3079_vm8 = vcmask 326656  }
 0x466   :  { %2745 = vrot.lane.b32.xlu1 %v2732_v31, %s3530_s27 }
 0x48e   :  { %v1561_v32 = vpop.permute.xlu0 %1560 }
 0x492   :  { %v1559_v34 = vpop.permute.xlu0 %1558 }
 0x493   :  { %v1569_v24 = vsel %vm1568_vm13, %v1559_v34, %v1561_v32 }
 0x495   :  { %v1730_v21 = vpop.permute.xlu1 %1729 }
 0x496   :  { %v1732_v26 = vpop.permute.xlu0 %1731 }
 0x497   :  { %v1738_v43 = vsel %vm764_vm11, %v1730_v21, %v1732_v26 }
 0x499   :  { %v1728_v33 = vpop.permute.xlu1 %1727 }
 0x49a   :  { %v1927_v27 = vpop.permute.xlu0 %1926  ;;  %v1737_v44 = vsel %vm764_vm11, %v1728_v33, %v1730_v21 }
 0x4a0   :  { %v4264_v36 = vpop.permute.xlu1 %2124  ;;  %v1935_v37 = vpop.permute.xlu0 %1934 }
 0x4a4   :  { %v1563_v40 = vpop.permute.xlu1 %1562  ;;  %v1567_v0 = vpop.permute.xlu0 %1566 }
 0x4a5   :  { %v1570_v41 = vsel %vm1568_vm13, %v1561_v32, %v1563_v40 }
 0x4a6   :  { %1580 = vmatprep.subr.mxu0 %v1570_v41 }
 0x4a7   :  { %1581 = vmatpush1.msra.mxu0 %v1569_v24 }
 0x4a8   :  { %v1565_v45 = vpop.permute.xlu1 %1564  ;;  %1748 = vmatprep.subr.mxu0 %v1738_v43  ;;  %v1734_v48 = vpop.permute.xlu0 %1733  ;;  %3311 = vmatmul.mubr.msk.f32.vlgmr.msra.gmra.mrb[2].mxu0 %vm616_vm14, %v3310_v22 }
 0x4a9   :  { %v1571_v49 = vsel %vm1568_vm13, %v1563_v40, %v1565_v45  ;;  %1749 = vmatpush1.msra.mxu0 %v1737_v44  ;;  %v1572_v51 = vsel %vm1568_vm13, %v1565_v45, %v1567_v0  ;;  %1812 = vmatprep.mubr.f32.mxu0 %v3515_v47  ;;  %v1739_v50 = vsel %vm764_vm11, %v1732_v26, %v1734_v48 }
 0x4aa   :  { %1651 = vmatprep.subr.mxu1 %v1572_v51 }
 0x4ab   :  { %1652 = vmatpush1.msra.mxu1 %v1571_v49 }
 0x4ac   :  { %v2133_v54 = vpop.permute.xlu1 %2132  ;;  %3312 = vmatmul.mubr.msk.f32.vlgmr.msra.gmra.mrb[2].mxu1 %vm616_vm14, %v3310_v22  ;;  %v1929_v4 = vpop.permute.xlu0 %1928 }
 0x4ad   :  { %1883 = vmatprep.mubr.f32.mxu1 %v3515_v47  ;;  %v1937_v15 = vsel %vm1936_vm4, %v1927_v27, %v1929_v4  ;;  %v3330_v27 = vadd.s32 4294967293, %v3613_v5 }
 0x4b0   :  { %v1736_v57 = vpop.permute.xlu1 %1735  ;;  %v2338_v58 = vpop.permute.xlu0 %2337  ;;  %3313 = vmatmul.mubr.msk.f32.vlgmr.msra.gmra.mrb[2].mxu0 %vm616_vm14, %v3308_v55 }
 0x4b1   :  { %v1740_v59 = vsel %vm764_vm11, %v1734_v48, %v1736_v57  ;;  %2012 = vmatprep.mubr.f32.mxu0 %v3515_v47  ;;  %vm2094_vm11 = vcmp.eq.s32.totalorder %v4259_v53, %v3613_v5  ;;  %v3073_v57 = vld [vmem:[%s4448_s8] sm:$0xff] }
 0x4b2   :  { %1819 = vmatprep.subr.mxu1 %v1740_v59  ;;  %vm2095_vm13 = vmand %vm2094_vm11, %vm1496_vm7 }
 0x4b3   :  { %1820 = vmatpush1.msra.mxu1 %v1739_v50  ;;  %v3319_v14 = vsel %vm2095_vm13, 1.0, %v3515_v47  ;;  %vm2749_vm13 = vcmask 777216  }
 0x4b4   :  { %v1931_v38 = vpop.permute.xlu1 %1930  ;;  %3314 = vmatmul.mubr.msk.f32.vlgmr.msra.gmra.mrb[2].mxu1 %vm616_vm14, %v3308_v55 }
 0x4b5   :  { %v4293_v61 = vpop.permute.xlu0 %2538  ;;  %v1938_v23 = vsel %vm1936_vm4, %v1929_v4, %v1931_v38  ;;  %2083 = vmatprep.mubr.f32.mxu1 %v3515_v47 }
 0x4b6   :  { %1948 = vmatprep.subr.mxu0 %v1938_v23 }
 0x4b7   :  { %1949 = vmatpush1.msra.mxu0 %v1937_v15 }
 0x4b8   :  { %v1933_v63 = vpop.permute.xlu1 %1932  ;;  %3317 = vmatmul.mubr.msk.f32.vlgmr.msra.gmra.mrb[2].mxu0 %vm616_vm14, %v3316_v62 }
 0x4b9   :  { %v1939_v1 = vsel %vm1936_vm4, %v1931_v38, %v1933_v63  ;;  %v2129_v42 = vpop.permute.xlu0 %2128  ;;  %v1940_v2 = vsel %vm1936_vm4, %v1933_v63, %v1935_v37  ;;  %2210 = vmatprep.mubr.f32.mxu0 %v3515_v47  ;;  %vm2503_vm4 = vcmp.eq.s32.totalorder %v4259_v53, %v3326_v29 }
 0x4ba   :  { %2019 = vmatprep.subr.mxu1 %v1940_v2  ;;  %vm2504_vm11 = vmand %vm2503_vm4, %vm1496_vm7 }
 0x4bb   :  { %2020 = vmatpush1.msra.mxu1 %v1939_v1  ;;  %v3327_v37 = vsel %vm2504_vm11, 1.0, %v3515_v47 }
 0x4bc   :  { %v2127_v6 = vpop.permute.xlu1 %2126  ;;  %3318 = vmatmul.mubr.msk.f32.vlgmr.msra.gmra.mrb[2].mxu1 %vm616_vm14, %v3316_v62 }
 0x4bd   :  { %v2135_v7 = vsel %vm2134_vm10, %v4264_v36, %v2127_v6  ;;  %v2131_v8 = vpop.permute.xlu0 %2130  ;;  %v2136_v9 = vsel %vm2134_vm10, %v2127_v6, %v2129_v42  ;;  %2281 = vmatprep.mubr.f32.mxu1 %v3515_v47 }
 0x4be   :  { %v2137_v46 = vsel %vm2134_vm10, %v2129_v42, %v2131_v8  ;;  %2146 = vmatprep.subr.mxu0 %v2136_v9  ;;  %v2138_v13 = vsel %vm2134_vm10, %v2131_v8, %v2133_v54  ;;  %vm2708_vm10 = vcmp.eq.s32.totalorder %v4259_v53, %v3330_v27 }
 0x4bf   :  { %2147 = vmatpush1.msra.mxu0 %v2135_v7  ;;  %2217 = vmatprep.subr.mxu1 %v2138_v13 }
 0x4c0   :  { %v2336_v12 = vpop.permute.xlu1 %2335  ;;  %2218 = vmatpush1.msra.mxu1 %v2137_v46  ;;  %3320 = vmatmul.mubr.msk.f32.vlgmr.msra.gmra.mrb[2].mxu0 %vm616_vm14, %v3319_v14 }
 0x4c1   :  { %v2332_v18 = vpop.permute.xlu0 %2331  ;;  %v2343_v20 = vsel %vm2339_vm9, %v2336_v12, %v2338_v58  ;;  %2415 = vmatprep.mubr.f32.mxu0 %v3515_v47 }
 0x4c2   :  { %2422 = vmatprep.subr.mxu1 %v2343_v20 }
 0x4c4   :  { %v2334_v16 = vpop.permute.xlu1 %2333  ;;  %3321 = vmatmul.mubr.msk.f32.vlgmr.msra.gmra.mrb[2].mxu1 %vm616_vm14, %v3319_v14 }
 0x4c5   :  { %v2342_v30 = vsel %vm2339_vm9, %v2334_v16, %v2336_v12  ;;  %v2330_v56 = vpop.permute.xlu0 %2329  ;;  %v2341_v60 = vsel %vm2339_vm9, %v2332_v18, %v2334_v16  ;;  %2486 = vmatprep.mubr.f32.mxu1 %v3515_v47 }
 0x4c6   :  { %v2340_v17 = vsel %vm2339_vm9, %v2330_v56, %v2332_v18  ;;  %2351 = vmatprep.subr.mxu0 %v2341_v60  ;;  %2423 = vmatpush1.msra.mxu1 %v2342_v30  ;;  %vm2709_vm9 = vmand %vm2708_vm10, %vm1496_vm7 }
 0x4c7   :  { %2352 = vmatpush1.msra.mxu0 %v2340_v17  ;;  %v3331_v43 = vsel %vm2709_vm9, 1.0, %v3515_v47 }
 0x4c8   :  { %v2543_v31 = vpop.permute.xlu1 %2542  ;;  %3324 = vmatmul.mubr.msk.f32.vlgmr.msra.gmra.mrb[2].mxu0 %vm616_vm14, %v3323_v25 }
 0x4c9   :  { %v2541_v32 = vpop.permute.xlu0 %2540  ;;  %2620 = vmatprep.mubr.f32.mxu0 %v3515_v47 }
 0x4ca   :  { %v2547_v34 = vsel %vm2544_vm12, %v4293_v61, %v2541_v32  ;;  %v2548_v21 = vsel %vm2544_vm12, %v2541_v32, %v2543_v31 }
 0x4cb   :  { %2627 = vmatprep.subr.mxu1 %v2548_v21 }
 0x4cc   :  { %v2537_v26 = vpop.permute.xlu1 %2536  ;;  %3325 = vmatmul.mubr.msk.f32.vlgmr.msra.gmra.mrb[2].mxu1 %vm616_vm14, %v3323_v25 }
 0x4cd   :  { %2628 = vmatpush1.msra.mxu1 %v2547_v34  ;;  %v2742_v35 = vpop.permute.xlu0 %2741  ;;  %v2546_v33 = vsel %vm2544_vm12, %v2537_v26, %v4293_v61  ;;  %2691 = vmatprep.mubr.f32.mxu1 %v3515_v47 }
 0x4ce   :  { %2556 = vmatprep.subr.mxu0 %v2546_v33 }
 0x4d0   :  { %v2535_v36 = vpop.permute.xlu1 %2534 }
 0x4d1   :  { %v2545_v39 = vsel %vm2544_vm12, %v2535_v36, %v2537_v26  ;;  %v2740_v40 = vpop.permute.xlu0 %2739 }
 0x4d2   :  { %2557 = vmatpush1.msra.mxu0 %v2545_v39  ;;  %v2750_v5 = vsel %vm2749_vm13, %v2740_v40, %v2742_v35 }
 0x4d3   :  { %3328 = vmatmul.mubr.msk.f32.vlgmr.msra.gmra.mrb[2].mxu0 %vm616_vm14, %v3327_v37 }
 0x4d4   :  { %v2744_v0 = vpop.permute.xlu1 %2743  ;;  %3329 = vmatmul.mubr.msk.f32.vlgmr.msra.gmra.mrb[2].mxu1 %vm616_vm14, %v3327_v37  ;;  %2825 = vmatprep.mubr.f32.mxu0 %v3515_v47 }
 0x4d5   :  { %v2751_v41 = vsel %vm2749_vm13, %v2742_v35, %v2744_v0  ;;  %2896 = vmatprep.mubr.f32.mxu1 %v3515_v47  ;;  %v2748_v22 = vpop.permute.xlu0 %2747 }
 0x4d6   :  { %2761 = vmatprep.subr.mxu0 %v2751_v41 }
 0x4d7   :  { %2762 = vmatpush1.msra.mxu0 %v2750_v5 }
 0x4d8   :  { %v2746_v24 = vpop.permute.xlu1 %2745 }
 0x4d9   :  { %v2752_v44 = vsel %vm2749_vm13, %v2744_v0, %v2746_v24  ;;  %v2753_v45 = vsel %vm2749_vm13, %v2746_v24, %v2748_v22 }
 0x4da   :  { %2832 = vmatprep.subr.mxu1 %v2753_v45 }
 0x4db   :  { %3332 = vmatmul.mubr.msk.f32.vlgmr.msra.gmra.mrb[2].mxu0 %vm616_vm14, %v3331_v43  ;;  %2833 = vmatpush1.msra.mxu1 %v2752_v44 }
 0x4dc   :  { %3333 = vmatmul.mubr.msk.f32.vlgmr.msra.gmra.mrb[2].mxu1 %vm616_vm14, %v3331_v43  ;;  %3409 = vmatprep.subr.bf16.mxu1 %v3498_v28 }
 0x4dd   :  { %3147 = vmatprep.mubr.f32.mxu0 %v3515_v47  ;;  %3377 = vmatprep.mubr.msk.f32.mxu1 %vm3519_vm15, %v3515_v47  ;;  %vm4463_vm15 = vcmask 867328  }
 0x4de   :  { %vm4464_vm7 = vmmov %vm4463_vm15 }
 0x4df   :  { %vm4465_vm6 = vmmov %vm4464_vm7 }
 0x5ae   :  { %v2827_v53 = vpop.f32.mrb[2].mxu0 }
 0x5af   :  { %2907 = vst [vmem:[#allocation4] sm:$0xf] %v2827_v53  ;;  %2969 = vrot.lane.b32.xlu1 %v2827_v53, %s3494_s21  ;;  %v2829_v48 = vpop.f32.mrb[3].mxu0  ;;  %v2898_v49 = vpop.f32.mrb[2].mxu1  ;;  %v2914_v54 = vrot.slane %v2827_v53, 4 }
 0x5b0   :  { %2908 = vst [vmem:[#allocation4 + $0x8] sm:$0xf] %v2829_v48  ;;  %2909 = vst [vmem:[#allocation4 + $0x10] sm:$0xf] %v2898_v49  ;;  %2939 = vrot.lane.b32.xlu0 %v2898_v49, %s3491_s19  ;;  %v2900_v51 = vpop.f32.mrb[3].mxu1  ;;  %v2916_v52 = vrot.slane %v2898_v49, 4 }
 0x5b1   :  { %v2915_v4 = vrot.slane %v2829_v48, 4  ;;  %v2917_v55 = vrot.slane %v2900_v51, 4 }
 0x5b3   :  { %3003 = vrot.lane.b32.xlu1 %v2827_v53, %s3496_s23 }
 0x5b4   :  { %2935 = vrot.lane.b32.xlu0 %v2827_v53, %s3491_s19 }
 0x5b7   :  { %2937 = vrot.lane.b32.xlu1 %v2829_v48, %s3491_s19 }
 0x5b8   :  { %2973 = vrot.lane.b32.xlu0 %v2898_v49, %s3494_s21 }
 0x5bb   :  { %2941 = vrot.lane.b32.xlu1 %v2900_v51, %s3491_s19 }
 0x5bc   :  { %3007 = vrot.lane.b32.xlu0 %v2898_v49, %s3496_s23 }
 0x5bf   :  { %2971 = vrot.lane.b32.xlu1 %v2829_v48, %s3494_s21 }
 0x5c0   :  { %2922 = vrot.lane.b32.xlu0 %v2916_v52, %s3492_s0 }
 0x5c3   :  { %3005 = vrot.lane.b32.xlu1 %v2829_v48, %s3496_s23 }
 0x5c4   :  { %2956 = vrot.lane.b32.xlu0 %v2916_v52, %s3493_s20 }
 0x5c7   :  { %2975 = vrot.lane.b32.xlu1 %v2900_v51, %s3494_s21 }
 0x5c8   :  { %2990 = vrot.lane.b32.xlu0 %v2916_v52, %s3495_s22 }
 0x5cb   :  { %3009 = vrot.lane.b32.xlu1 %v2900_v51, %s3496_s23 }
 0x5cc   :  { %3024 = vrot.lane.b32.xlu0 %v2916_v52, %s3497_s24 }
 0x5cf   :  { %2918 = vrot.lane.b32.xlu1 %v2914_v54, %s3492_s0 }
 0x5d0   :  { %2986 = vrot.lane.b32.xlu0 %v2914_v54, %s3495_s22 }
 0x5d3   :  { %2952 = vrot.lane.b32.xlu1 %v2914_v54, %s3493_s20 }
 0x5d4   :  { %3020 = vrot.lane.b32.xlu0 %v2914_v54, %s3497_s24 }
 0x5d7   :  { %2920 = vrot.lane.b32.xlu1 %v2915_v4, %s3492_s0 }
 0x5d8   :  { %2924 = vrot.lane.b32.xlu0 %v2917_v55, %s3492_s0 }
 0x5db   :  { %2954 = vrot.lane.b32.xlu1 %v2915_v4, %s3493_s20 }
 0x5dc   :  { %2958 = vrot.lane.b32.xlu0 %v2917_v55, %s3493_s20 }
 0x5df   :  { %2988 = vrot.lane.b32.xlu1 %v2915_v4, %s3495_s22 }
 0x5e0   :  { %2992 = vrot.lane.b32.xlu0 %v2917_v55, %s3495_s22 }
 0x5e3   :  { %3022 = vrot.lane.b32.xlu1 %v2915_v4, %s3497_s24 }
 0x5e4   :  { %3026 = vrot.lane.b32.xlu0 %v2917_v55, %s3497_s24 }
 0x5e7   :  { %3039 = vrot.lane.b32.xlu1 %v2829_v48, %s3499_s25 }
 0x5e8   :  { %3041 = vrot.lane.b32.xlu0 %v2898_v49, %s3499_s25 }
 0x5eb   :  { %3037 = vrot.lane.b32.xlu1 %v2827_v53, %s3499_s25 }
 0x5ec   :  { %3043 = vrot.lane.b32.xlu0 %v2900_v51, %s3499_s25 }
 0x5ef   :  { %3076 = vperm.xlu1 %3481, %v3073_v57  }
 0x621   :  { %v2970_v58 = vpop.permute.xlu1 %2969 }
 0x622   :  { %v2940_v59 = vpop.permute.xlu0 %2939 }
 0x625   :  { %v3004_v50 = vpop.permute.xlu1 %3003 }
 0x626   :  { %v2936_v38 = vpop.permute.xlu0 %2935 }
 0x629   :  { %v2938_v61 = vpop.permute.xlu1 %2937 }
 0x62a   :  { %v2943_v23 = vsel %vm135_vm0, %v2936_v38, %v2938_v61  ;;  %v2944_v62 = vsel %vm135_vm0, %v2938_v61, %v2940_v59  ;;  %v2974_v15 = vpop.permute.xlu0 %2973 }
 0x62b   :  { %2949 = vst [vmem:[#allocation4 + $0x18] sm:$0xf] %v2943_v23  ;;  %2950 = vst [vmem:[#allocation4 + $0x20] sm:$0xf] %v2944_v62 }
 0x62d   :  { %v2942_v63 = vpop.permute.xlu1 %2941 }
 0x62e   :  { %v2945_v1 = vsel %vm135_vm0, %v2940_v59, %v2942_v63  ;;  %v3008_v42 = vpop.permute.xlu0 %3007  ;;  %vm4457_vm0 = vcmask 949248  }
 0x62f   :  { %2951 = vst [vmem:[#allocation4 + $0x28] sm:$0xf] %v2945_v1 }
 0x631   :  { %v2972_v2 = vpop.permute.xlu1 %2971 }
 0x632   :  { %v2977_v3 = vsel %vm209_vm3, %v2970_v58, %v2972_v2  ;;  %v2978_v6 = vsel %vm209_vm3, %v2972_v2, %v2974_v15  ;;  %v2923_v7 = vpop.permute.xlu0 %2922 }
 0x633   :  { %2983 = vst [vmem:[#allocation4 + $0x30] sm:$0xf] %v2977_v3  ;;  %2984 = vst [vmem:[#allocation4 + $0x38] sm:$0xf] %v2978_v6 }
 0x635   :  { %v3006_v8 = vpop.permute.xlu1 %3005 }
 0x636   :  { %v3011_v9 = vsel %vm283_vm5, %v3004_v50, %v3006_v8  ;;  %v3012_v14 = vsel %vm283_vm5, %v3006_v8, %v3008_v42  ;;  %v2957_v46 = vpop.permute.xlu0 %2956  ;;  %v3057_v8 = vld [vmem:[%s4449_s7] sm:$0xff] }
 0x637   :  { %3017 = vst [vmem:[#allocation4 + $0x48] sm:$0xf] %v3011_v9  ;;  %3018 = vst [vmem:[#allocation4 + $0x50] sm:$0xf] %v3012_v14 }
 0x639   :  { %v2976_v13 = vpop.permute.xlu1 %2975 }
 0x63a   :  { %v2979_v12 = vsel %vm209_vm3, %v2974_v15, %v2976_v13  ;;  %v2991_v18 = vpop.permute.xlu0 %2990  ;;  %vm4458_vm3 = vmmov %vm4457_vm0 }
 0x63b   :  { %2985 = vst [vmem:[#allocation4 + $0x40] sm:$0xf] %v2979_v12 }
 0x63d   :  { %v3010_v20 = vpop.permute.xlu1 %3009 }
 0x63e   :  { %v3013_v16 = vsel %vm283_vm5, %v3008_v42, %v3010_v20  ;;  %v3025_v30 = vpop.permute.xlu0 %3024  ;;  %vm4460_vm5 = vcmask 875520  }
 0x63f   :  { %3019 = vst [vmem:[#allocation4 + $0x58] sm:$0xf] %v3013_v16  ;;  %vm4461_vm14 = vmmov %vm4460_vm5 }
 0x641   :  { %v2919_v56 = vpop.permute.xlu1 %2918 }
 0x642   :  { %v2987_v60 = vpop.permute.xlu0 %2986 }
 0x645   :  { %v2953_v25 = vpop.permute.xlu1 %2952 }
 0x646   :  { %v3021_v17 = vpop.permute.xlu0 %3020 }
 0x649   :  { %v2921_v29 = vpop.permute.xlu1 %2920 }
 0x64a   :  { %v2926_v31 = vsel %vm98_vm2, %v2919_v56, %v2921_v29  ;;  %v2927_v32 = vsel %vm98_vm2, %v2921_v29, %v2923_v7  ;;  %v2925_v34 = vpop.permute.xlu0 %2924 }
 0x64b   :  { %2932 = vst [vmem:[#allocation4] sm:$0xf0] %v2926_v31  ;;  %2933 = vst [vmem:[#allocation4 + $0x8] sm:$0xf0] %v2927_v32  ;;  %v2928_v21 = vsel %vm98_vm2, %v2923_v7, %v2925_v34 }
 0x64c   :  { %2934 = vst [vmem:[#allocation4 + $0x10] sm:$0xf0] %v2928_v21  ;;  %vm4459_vm2 = vmmov %vm4457_vm0 }
 0x64d   :  { %v2955_v26 = vpop.permute.xlu1 %2954 }
 0x64e   :  { %v2960_v35 = vsel %vm172_vm1, %v2953_v25, %v2955_v26  ;;  %v2961_v33 = vsel %vm172_vm1, %v2955_v26, %v2957_v46  ;;  %v2959_v27 = vpop.permute.xlu0 %2958 }
 0x64f   :  { %2966 = vst [vmem:[#allocation4 + $0x18] sm:$0xf0] %v2960_v35  ;;  %2967 = vst [vmem:[#allocation4 + $0x20] sm:$0xf0] %v2961_v33  ;;  %v2962_v36 = vsel %vm172_vm1, %v2957_v46, %v2959_v27  ;;  %v3224_v46 = vld [vmem:[%s4450_s13] sm:$0x7] }
 0x650   :  { %2968 = vst [vmem:[#allocation4 + $0x28] sm:$0xf0] %v2962_v36  ;;  %vm4462_vm1 = vmmov %vm4460_vm5  ;;  %v3229_v13 = vrot.slane %v3224_v46, %v4047_v10  ;;  %v3237_v25 = vrot.slane %v3224_v46, %v4061_v19  ;;  %v3268_v10 = vld [vmem:[%s4451_s9] sm:$0xff] }
 0x651   :  { %v2989_v37 = vpop.permute.xlu1 %2988 }
 0x652   :  { %v2994_v39 = vsel %vm4457_vm0, %v2987_v60, %v2989_v37  ;;  %v2995_v40 = vsel %vm4458_vm3, %v2989_v37, %v2991_v18  ;;  %v2993_v0 = vpop.permute.xlu0 %2992  ;;  %v3059_v22 = vld [vmem:[#allocation4 + $0x8] sm:$0xff]  ;;  %v3058_v53 = vld [vmem:[#allocation4] sm:$0xff] }
 0x653   :  { %3000 = vst [vmem:[#allocation4 + $0x30] sm:$0xf0] %v2994_v39  ;;  %3001 = vst [vmem:[#allocation4 + $0x38] sm:$0xf0] %v2995_v40  ;;  %v2996_v41 = vsel %vm4459_vm2, %v2991_v18, %v2993_v0  ;;  %v3060_v54 = vld [vmem:[#allocation4 + $0x10] sm:$0xff]  ;;  %v3233_v18 = vrot.slane %v3224_v46, %v4053_v11 }
 0x654   :  { %3002 = vst [vmem:[#allocation4 + $0x40] sm:$0xf0] %v2996_v41 }
 0x655   :  { %v3023_v5 = vpop.permute.xlu1 %3022 }
 0x656   :  { %v3028_v24 = vsel %vm4460_vm5, %v3021_v17, %v3023_v5  ;;  %v3029_v43 = vsel %vm4461_vm14, %v3023_v5, %v3025_v30  ;;  %v3027_v44 = vpop.permute.xlu0 %3026  ;;  %v3062_v45 = vld [vmem:[#allocation4 + $0x20] sm:$0xff]  ;;  %v3061_v48 = vld [vmem:[#allocation4 + $0x18] sm:$0xff] }
 0x657   :  { %3034 = vst [vmem:[#allocation4 + $0x48] sm:$0xf0] %v3028_v24  ;;  %3035 = vst [vmem:[#allocation4 + $0x50] sm:$0xf0] %v3029_v43  ;;  %v3030_v49 = vsel %vm4462_vm1, %v3025_v30, %v3027_v44  ;;  %v3401_v51 = vpack.c.bf16 %v3062_v45, %v3059_v22  ;;  %v3403_v52 = vpack.c.bf16 %v3061_v48, %v3058_v53  ;;  %v3063_v4 = vld [vmem:[#allocation4 + $0x28] sm:$0xff]  ;;  %v3277_v22 = vld [vmem:[%s4452_s10] sm:$0xff] }
 0x658   :  { %3036 = vst [vmem:[#allocation4 + $0x58] sm:$0xf0] %v3030_v49  ;;  %v3410_v55 = vpack.c.bf16 %v3063_v4, %v3060_v54 }
 0x659   :  { %3402 = vmatprep.subr.bf16.mxu0 %v3401_v51  ;;  %v3040_v57 = vpop.permute.xlu1 %3039 }
 0x65a   :  { %3404 = vmatpush1.bf16.msra.mxu0 %v3403_v52  ;;  %3411 = vmatpush3.bf16.msra.mxu1 %v3410_v55  ;;  %v3042_v58 = vpop.permute.xlu0 %3041  ;;  %v3065_v38 = vld [vmem:[#allocation4 + $0x38] sm:$0xff]  ;;  %v3064_v15 = vld [vmem:[#allocation4 + $0x30] sm:$0xff] }
 0x65b   :  { %v3046_v59 = vsel %vm4463_vm15, %v3040_v57, %v3042_v58  ;;  %3412 = vmatprep.subr.bf16.mxu1 %v3498_v28  ;;  %v3066_v3 = vld [vmem:[#allocation4 + $0x40] sm:$0xff] }
 0x65c   :  { %3052 = vst [vmem:[#allocation4 + $0x68] sm:$0xf] %v3046_v59 }
 0x65d   :  { %v3038_v50 = vpop.permute.xlu1 %3037 }
 0x65e   :  { %v3045_v61 = vsel %vm4464_vm7, %v3038_v50, %v3040_v57  ;;  %v3044_v23 = vpop.permute.xlu0 %3043  ;;  %v3068_v62 = vld [vmem:[#allocation4 + $0x50] sm:$0xff]  ;;  %v3067_v63 = vld [vmem:[#allocation4 + $0x48] sm:$0xff] }
 0x65f   :  { %3051 = vst [vmem:[#allocation4 + $0x60] sm:$0xf] %v3045_v61  ;;  %v3047_v1 = vsel %vm4465_vm6, %v3042_v58, %v3044_v23  ;;  %v3405_v42 = vpack.c.bf16 %v3068_v62, %v3065_v38  ;;  %v3407_v2 = vpack.c.bf16 %v3067_v63, %v3064_v15  ;;  %v3069_v6 = vld [vmem:[#allocation4 + $0x58] sm:$0xff] }
 0x660   :  { %3053 = vst [vmem:[#allocation4 + $0x70] sm:$0xf] %v3047_v1  ;;  %v3413_v7 = vpack.c.bf16 %v3069_v6, %v3066_v3 }
 0x661   :  { %3406 = vmatprep.subr.bf16.mxu0 %v3405_v42 }
 0x662   :  { %3408 = vmatpush1.bf16.msra.mxu0 %v3407_v2  ;;  %3414 = vmatpush3.bf16.msra.mxu1 %v3413_v7 }
 0x663   :  { %v3071_v28 = vld [vmem:[#allocation4 + $0x68] sm:$0xff]  ;;  %3375 = vmatprep.subr.mxu1 %v3515_v47 }
 0x664   :  { %3091 = vmatprep.subr.mxu0 %v3071_v28 }
 0x666   :  { %v3070_v9 = vld [vmem:[#allocation4 + $0x60] sm:$0xff] }
 0x667   :  { %3092 = vmatpush1.msra.mxu0 %v3070_v9  ;;  %v3072_v14 = vld [vmem:[#allocation4 + $0x70] sm:$0xff] }
 0x668   :  { %3334 = vmatmul.mubr.msk.f32.vlgmr.msra.gmra.mrb[4].mxu0 %vm3079_vm8, %v3057_v8  ;;  %3376 = vmatpush3.msra.mxu1 %v3072_v14 }
 0x669   :  { %3378 = vmatmul.mubr.msk.f32.vlgmr.msra.gmra.mrb[4].mxu1 %vm3079_vm8, %v3057_v8 }
 0x66e   :  { %v3077_v12 = vpop.permute.xlu1 %3076 }
 0x73b   :  { %v3149_v47 = vpop.f32.mrb[4].mxu0 }
 0x73c   :  { %v3150_v20 = vadd.f32 %v3149_v47, %v3077_v12  ;;  %v3151_v16 = vpop.f32.mrb[5].mxu0  ;;  %v3220_v30 = vpop.f32.mrb[4].mxu1 }
 0x73d   :  { %v3152_v56 = vadd.f32 %v3151_v16, %v3077_v12  ;;  %v3221_v60 = vadd.f32 %v3220_v30, %v3077_v12  ;;  %v3379_v17 = vpop.f32.mrb[5].mxu1 }
 0x73e   :  { %v3241_v29 = vmul.f32 %v3229_v13, %v3150_v20 }
 0x73f   :  { %v3242_v31 = vmul.f32 %v3233_v18, %v3152_v56  ;;  %v3243_v34 = vmul.f32 %v3237_v25, %v3221_v60 }
 0x741   :  { %v3244_v32 = vadd.f32 %v3242_v31, %v3241_v29 }
 0x743   :  { %v3245_v21 = vadd.f32 %v3244_v32, %v3243_v34 }
 0x745   :  { %3246 = vadd.xlane.f32.xlu0 %v3245_v21 }
 0x75b   :  { %3271 = vperm.xlu0 %3480, %v3268_v10  }
 0x7d2   :  { %v3247_v11 = vpop.xlane.xlu0 %3246 }
 0x7d3   :  { %v3248_v26 = vmul.f32 0.00390625, %v3247_v11 }
 0x7d5   :  { %v3249_v35 = vsub.f32 %v3150_v20, %v3248_v26  ;;  %v3250_v33 = vsub.f32 %v3152_v56, %v3248_v26  ;;  %v3251_v27 = vsub.f32 %v3221_v60, %v3248_v26 }
 0x7d7   :  { %v3252_v36 = vmul.f32 %v3249_v35, %v3249_v35  ;;  %v3253_v37 = vmul.f32 %v3250_v33, %v3250_v33  ;;  %v3254_v19 = vmul.f32 %v3251_v27, %v3251_v27 }
 0x7d9   :  { %v3255_v39 = vmul.f32 %v3252_v36, %v3229_v13  ;;  %v3256_v40 = vmul.f32 %v3253_v37, %v3233_v18  ;;  %v3257_v0 = vmul.f32 %v3254_v19, %v3237_v25 }
 0x7da   :  { %v3272_v51 = vpop.permute.xlu0 %3271 }
 0x7db   :  { %v3258_v41 = vadd.f32 %v3256_v40, %v3255_v39 }
 0x7dd   :  { %v3259_v5 = vadd.f32 %v3258_v41, %v3257_v0 }
 0x7df   :  { %3260 = vadd.xlane.f32.xlu1 %v3259_v5 }
 0x7f0   :  { %3280 = vperm.xlu1 %3481, %v3277_v22  }
 0x86c   :  { %v3261_v24 = vpop.xlane.xlu1 %3260 }
 0x86d   :  { %v3262_v43 = vmul.f32 0.00390625, %v3261_v24 }
 0x86f   :  { %v3263_v44 = vadd.f32 1e-05, %v3262_v43 }
 0x870   :  { %v3281_v55 = vpop.permute.xlu1 %3280 }
 0x871   :  { %3488 = vrsqrt.f32 %v3263_v44 }
 0x87b   :  { %v3489_v45 = vpop.eup %3488 }
 0x87c   :  { %v3265_v53 = vmul.f32 %v3489_v45, %v3249_v35  ;;  %v3266_v48 = vmul.f32 %v3489_v45, %v3250_v33  ;;  %v3267_v49 = vmul.f32 %v3489_v45, %v3251_v27 }
 0x87e   :  { %v3274_v52 = vmul.f32 %v3272_v51, %v3265_v53  ;;  %v3275_v54 = vmul.f32 %v3272_v51, %v3266_v48  ;;  %v3276_v4 = vmul.f32 %v3272_v51, %v3267_v49 }
 0x880   :  { %v3283_v57 = vadd.f32 %v3281_v55, %v3274_v52  ;;  %v3284_v58 = vadd.f32 %v3281_v55, %v3275_v54  ;;  %v3285_v59 = vadd.f32 %v3281_v55, %v3276_v4 }
 0x882   :  { %v3286_v50 = vmax.f32 %v3283_v57, 0.0  ;;  %v3287_v38 = vmax.f32 %v3284_v58, 0.0  ;;  %v3288_v61 = vmax.f32 %v3285_v59, 0.0 }
 0x884   :  { %3289 = vst [vmem:[%s4453_s14] sm:$0xff] %v3286_v50  ;;  %3290 = vst [vmem:[%s4453_s14 + $0x8] sm:$0xff] %v3287_v38 }
 0x885   :  { %3291 = vst [vmem:[%s4453_s14 + $0x10] sm:$0xff] %v3288_v61 }

</bundles_post_ra>
